<compile_context>
chip_gen: v6e
topology: v6e:2x2x1
jax: 0.10.0
libtpu: 0.0.40
codegen_flags: <defaults>
</compile_context>

<pallas_src>
import math

import jax
import jax.numpy as jnp
from jax.experimental import pallas as pl
from jax.experimental.pallas import tpu as pltpu

# ---------------- synthetic "distilbert-base-uncased"-like config (small) ---
VOCAB = 100
MAX_POS = 16
HIDDEN = 64          # distilbert hidden_size (scaled down)
N_HEADS = 2
N_LAYERS = 2
FFN = 128
N_CLASSES = 2
LN_EPS = 1e-12

# bf16 matmul inputs + f32 accumulation (v6e/v7x MXU-friendly; also native on v5e)
MATMUL_DTYPE = jnp.bfloat16


def _full_spec(shape):
    nd = len(shape)
    return pl.BlockSpec(shape, lambda i, _nd=nd: (0,) * _nd)


# ------------------------------- fused kernel --------------------------------
def _fused_kernel(x0_ref, mask_ref, sent_ref, emb_g_ref, emb_b_ref,
                  wqkv_ref, bqkv_ref, wo_ref, bo_ref,
                  ln1_g_ref, ln1_b_ref, w1_ref, b1_ref, w2_ref, b2_ref,
                  ln2_g_ref, ln2_b_ref,
                  pre_w_ref, pre_b_ref, clsh_w_ref, clss_w_ref, cls_b_ref,
                  o_ref):
    BS, H = x0_ref.shape
    B, S = mask_ref.shape
    hd = H // N_HEADS
    scale = 1.0 / math.sqrt(hd)

    def ln(t2, g, b):
        mu = jnp.mean(t2, axis=-1, keepdims=True)
        var = jnp.mean(jnp.square(t2 - mu), axis=-1, keepdims=True)
        return (t2 - mu) * jax.lax.rsqrt(var + LN_EPS) * g + b

    def mm(t2, w, b):
        # bf16 (or f32) operands, f32 accumulation on the MXU.
        return jnp.dot(t2.astype(w.dtype), w,
                       preferred_element_type=jnp.float32) + b

    # Additive key mask, materialized ONCE and shared by all layers / heads.
    # Head-stacked batch ordering is [h0:b0,b1, h1:b0,b1, ...].
    bias = (mask_ref[...].astype(jnp.float32)[:, None, :] - 1.0) * 1e9     # (B,1,S)
    bias_h = jnp.broadcast_to(jnp.concatenate([bias] * N_HEADS, axis=0),
                              (N_HEADS * B, S, S))                         # (NH*B,S,S)

    # Embedding LayerNorm (dropouts everywhere are identity at inference).
    x = ln(x0_ref[...].astype(jnp.float32), emb_g_ref[...], emb_b_ref[...])  # (BS,H)

    # Static unroll over layers; stacked weights indexed with static layer index.
    # TODO(synk): at real DistilBERT scale (H=768, 6 layers) stream stacked layer
    # weights from HBM via a layer grid axis / pl.ANY + manual DMA instead of
    # keeping them all VMEM-resident (v7x has only 64 MiB VMEM per TC), and add
    # a "parallel" batch grid axis so both v7x TensorCores are used.
    for l in range(N_LAYERS):
        qkv = mm(x, wqkv_ref[l], bqkv_ref[l])                # (BS, 3H) — fused QKV
        qkv3 = qkv.reshape(B, S, 3 * H)

        def heads(base):
            # stack heads along the leading (batch) axis: (NH*B, S, hd)
            return jnp.concatenate(
                [qkv3[:, :, base + h * hd: base + (h + 1) * hd]
                 for h in range(N_HEADS)], axis=0)

        qh, kh, vh = heads(0), heads(H), heads(2 * H)

        sc = jnp.einsum('bqd,bkd->bqk', qh, kh,
                        preferred_element_type=jnp.float32) * scale + bias_h
        sc = sc - jnp.max(sc, axis=-1, keepdims=True)
        p = jnp.exp(sc)
        p = p * pl.reciprocal(jnp.sum(p, axis=-1, keepdims=True), approx=True)
        ctx = jnp.einsum('bqk,bkd->bqd', p, vh,
                         preferred_element_type=jnp.float32)  # (NH*B, S, hd)
        # merge heads back onto the lane axis: (B, S, H)
        ctx = jnp.concatenate([ctx[h * B:(h + 1) * B] for h in range(N_HEADS)],
                              axis=-1)
        attn_out = mm(ctx.reshape(BS, H), wo_ref[l], bo_ref[l])

        h1 = ln(x + attn_out, ln1_g_ref[l], ln1_b_ref[l])
        ff = jax.nn.gelu(mm(h1, w1_ref[l], b1_ref[l]), approximate=True)
        ff = mm(ff, w2_ref[l], b2_ref[l])
        x = ln(h1 + ff, ln2_g_ref[l], ln2_b_ref[l])

    # Classifier head rides along in the same kernel (no extra launch).
    cls = x.reshape(B, S, H)[:, 0, :]                                   # CLS token
    hid = jnp.maximum(mm(cls, pre_w_ref[...], pre_b_ref[...]), 0.0)     # ReLU
    # nn.Dropout(p=0.3) is identity at inference.
    # concat([hid, sentiment]) @ W == hid @ W[:H] + sentiment * W[H:]
    out = (jnp.dot(hid, clsh_w_ref[...], preferred_element_type=jnp.float32)
           + sent_ref[...] * clss_w_ref[...]
           + cls_b_ref[...])
    o_ref[...] = out.astype(o_ref.dtype)


# ------------------------------- wrapper --------------------------------------
def sarcasm_classifier(input_ids, attention_mask, sentiment, params):
    B, S = input_ids.shape
    H = HIDDEN
    L = N_LAYERS

    # Embedding gathers are glue; everything else runs in ONE fused Pallas call.
    x0 = (params['word_emb'][input_ids]
          + params['pos_emb'][jnp.arange(S)][None, :, :]).reshape(B * S, H)

    stack = lambda name: jnp.stack([lp[name] for lp in params['layers']])
    to_mm = lambda a: a.astype(MATMUL_DTYPE)

    wqkv = to_mm(jnp.stack(
        [jnp.concatenate([lp['wq'], lp['wk'], lp['wv']], axis=1)
         for lp in params['layers']]))                                  # (L, H, 3H)
    bqkv = jnp.stack([jnp.concatenate([lp['bq'], lp['bk'], lp['bv']])
                      for lp in params['layers']]).reshape(L, 1, 3 * H)
    wo = to_mm(stack('wo'))                                             # (L, H, H)
    bo = stack('bo').reshape(L, 1, H)
    ln1_g = stack('ln1_g').reshape(L, 1, H)
    ln1_b = stack('ln1_b').reshape(L, 1, H)
    w1 = to_mm(stack('w1'))                                             # (L, H, FFN)
    b1 = stack('b1').reshape(L, 1, FFN)
    w2 = to_mm(stack('w2'))                                             # (L, FFN, H)
    b2 = stack('b2').reshape(L, 1, H)
    ln2_g = stack('ln2_g').reshape(L, 1, H)
    ln2_b = stack('ln2_b').reshape(L, 1, H)

    args = (x0,
            attention_mask.astype(jnp.float32),
            sentiment.reshape(B, 1).astype(jnp.float32),
            params['emb_ln_g'].reshape(1, H), params['emb_ln_b'].reshape(1, H),
            wqkv, bqkv, wo, bo, ln1_g, ln1_b, w1, b1, w2, b2, ln2_g, ln2_b,
            to_mm(params['pre_w']), params['pre_b'].reshape(1, H),
            params['cls_w'][:H],                # (H, n_classes)
            params['cls_w'][H:],                # (1, n_classes) — sentiment column
            params['cls_b'].reshape(1, N_CLASSES))

    return pl.pallas_call(
        _fused_kernel,
        out_shape=jax.ShapeDtypeStruct((B, N_CLASSES), jnp.float32),
        grid=(1,),
        in_specs=[_full_spec(a.shape) for a in args],
        out_specs=_full_spec((B, N_CLASSES)),
        compiler_params=pltpu.CompilerParams(dimension_semantics=("arbitrary",)),
    )(*args)


# ----------------------------- pure-JAX reference ---------------------------
def _ref_ln(x, g, b):
    mu = x.mean(-1, keepdims=True)
    var = jnp.square(x - mu).mean(-1, keepdims=True)
    return (x - mu) * jax.lax.rsqrt(var + LN_EPS) * g + b


def _ref_layer(x, mask, p):
    B, S, H = x.shape
    lin = lambda t, w, b: t @ w + b
    q = lin(x, p['wq'], p['bq'])
    k = lin(x, p['wk'], p['bk'])
    v = lin(x, p['wv'], p['bv'])
    bias = (mask[:, None, :] - 1.0) * 1e9
    hd = H // N_HEADS
    ctx = []
    for h in range(N_HEADS):
        sl = slice(h * hd, (h + 1) * hd)
        sc = jnp.einsum('bqd,bkd->bqk', q[..., sl], k[..., sl]) / math.sqrt(hd) + bias
        sc = sc - sc.max(-1, keepdims=True)
        pr = jnp.exp(sc)
        pr = pr / pr.sum(-1, keepdims=True)
        ctx.append(jnp.einsum('bqk,bkd->bqd', pr, v[..., sl]))
    attn = lin(jnp.concatenate(ctx, -1), p['wo'], p['bo'])
    h1 = _ref_ln(x + attn, p['ln1_g'], p['ln1_b'])
    ff = jax.nn.gelu(lin(h1, p['w1'], p['b1']), approximate=True)
    ff = lin(ff, p['w2'], p['b2'])
    return _ref_ln(h1 + ff, p['ln2_g'], p['ln2_b'])


def sarcasm_classifier_ref(input_ids, attention_mask, sentiment, params):
    S = input_ids.shape[1]
    x = params['word_emb'][input_ids] + params['pos_emb'][jnp.arange(S)][None]
    x = _ref_ln(x, params['emb_ln_g'], params['emb_ln_b'])
    for lp in params['layers']:
        x = _ref_layer(x, attention_mask.astype(jnp.float32), lp)
    cls = x[:, 0, :]
    h = jnp.maximum(cls @ params['pre_w'] + params['pre_b'], 0.0)
    z = jnp.concatenate([h, sentiment[:, None]], axis=1)
    return z @ params['cls_w'] + params['cls_b']


# ------------------------------- params --------------------------------------
def init_params(key):
    keys = iter(jax.random.split(key, 32))
    w = lambda shape: 0.02 * jax.random.normal(next(keys), shape, jnp.float32)
    zeros = lambda n: jnp.zeros((n,), jnp.float32)
    ones = lambda n: jnp.ones((n,), jnp.float32)
    params = {
        'word_emb': w((VOCAB, HIDDEN)),
        'pos_emb': w((MAX_POS, HIDDEN)),
        'emb_ln_g': ones(HIDDEN), 'emb_ln_b': zeros(HIDDEN),
        'layers': [],
        'pre_w': w((HIDDEN, HIDDEN)), 'pre_b': zeros(HIDDEN),
        'cls_w': w((HIDDEN + 1, N_CLASSES)), 'cls_b': zeros(N_CLASSES),
    }
    for _ in range(N_LAYERS):
        params['layers'].append({
            'wq': w((HIDDEN, HIDDEN)), 'bq': zeros(HIDDEN),
            'wk': w((HIDDEN, HIDDEN)), 'bk': zeros(HIDDEN),
            'wv': w((HIDDEN, HIDDEN)), 'bv': zeros(HIDDEN),
            'wo': w((HIDDEN, HIDDEN)), 'bo': zeros(HIDDEN),
            'ln1_g': ones(HIDDEN), 'ln1_b': zeros(HIDDEN),
            'w1': w((HIDDEN, FFN)), 'b1': zeros(FFN),
            'w2': w((FFN, HIDDEN)), 'b2': zeros(HIDDEN),
            'ln2_g': ones(HIDDEN), 'ln2_b': zeros(HIDDEN),
        })
    return params


if __name__ == "__main__":
    B, S = 2, 8
    key = jax.random.PRNGKey(0)
    k_ids, k_sent, k_param = jax.random.split(key, 3)
    input_ids = jax.random.randint(k_ids, (B, S), 0, VOCAB, dtype=jnp.int32)
    lengths = jnp.array([S, S - 2], jnp.int32)
    attention_mask = (jnp.arange(S)[None, :] < lengths[:, None]).astype(jnp.float32)
    sentiment = jax.random.uniform(k_sent, (B,), jnp.float32, -1.0, 1.0)
    params = init_params(k_param)

    out = sarcasm_classifier(input_ids, attention_mask, sentiment, params)
    out = jax.block_until_ready(out)
    ref = sarcasm_classifier_ref(input_ids, attention_mask, sentiment, params)

    assert out.shape == (B, N_CLASSES)
    assert bool(jnp.all(jnp.isfinite(out)))
    # Tolerance accounts for bf16 matmul operands (f32 accumulation) vs f32 reference.
    assert bool(jnp.allclose(out, ref, atol=2e-3, rtol=2e-2)), (out, ref)
    print("KERNEL_OK")
</pallas_src>

<mosaic_0001>
module attributes {stable_mosaic.version = 11 : i64} {
  func.func @_fused_kernel(%arg0: i32, %arg1: memref<16x64xf32, #tpu.memory_space<vmem>>, %arg2: memref<2x8xf32, #tpu.memory_space<vmem>>, %arg3: memref<2x1xf32, #tpu.memory_space<vmem>>, %arg4: memref<1x64xf32, #tpu.memory_space<vmem>>, %arg5: memref<1x64xf32, #tpu.memory_space<vmem>>, %arg6: memref<2x64x192xbf16, #tpu.memory_space<vmem>>, %arg7: memref<2x1x192xf32, #tpu.memory_space<vmem>>, %arg8: memref<2x64x64xbf16, #tpu.memory_space<vmem>>, %arg9: memref<2x1x64xf32, #tpu.memory_space<vmem>>, %arg10: memref<2x1x64xf32, #tpu.memory_space<vmem>>, %arg11: memref<2x1x64xf32, #tpu.memory_space<vmem>>, %arg12: memref<2x64x128xbf16, #tpu.memory_space<vmem>>, %arg13: memref<2x1x128xf32, #tpu.memory_space<vmem>>, %arg14: memref<2x128x64xbf16, #tpu.memory_space<vmem>>, %arg15: memref<2x1x64xf32, #tpu.memory_space<vmem>>, %arg16: memref<2x1x64xf32, #tpu.memory_space<vmem>>, %arg17: memref<2x1x64xf32, #tpu.memory_space<vmem>>, %arg18: memref<64x64xbf16, #tpu.memory_space<vmem>>, %arg19: memref<1x64xf32, #tpu.memory_space<vmem>>, %arg20: memref<64x2xf32, #tpu.memory_space<vmem>>, %arg21: memref<1x2xf32, #tpu.memory_space<vmem>>, %arg22: memref<1x2xf32, #tpu.memory_space<vmem>>, %arg23: memref<2x2xf32, #tpu.memory_space<vmem>>) attributes {dimension_semantics = [#tpu.dimension_semantics<arbitrary>], iteration_bounds = array<i64: 1>, scalar_prefetch = 0 : i64, scratch_operands = 0 : i64, tpu.core_type = #tpu.core_type<tc>, window_params = [{pipeline_mode = #tpu.pipeline_mode<synchronous>, transform_indices = @transform_0, window_bounds = array<i64: 16, 64>}, {pipeline_mode = #tpu.pipeline_mode<synchronous>, transform_indices = @transform_1, window_bounds = array<i64: 2, 8>}, {pipeline_mode = #tpu.pipeline_mode<synchronous>, transform_indices = @transform_2, window_bounds = array<i64: 2, 1>}, {pipeline_mode = #tpu.pipeline_mode<synchronous>, transform_indices = @transform_3, window_bounds = array<i64: 1, 64>}, {pipeline_mode = #tpu.pipeline_mode<synchronous>, transform_indices = @transform_4, window_bounds = array<i64: 1, 64>}, {pipeline_mode = #tpu.pipeline_mode<synchronous>, transform_indices = @transform_5, window_bounds = array<i64: 2, 64, 192>}, {pipeline_mode = #tpu.pipeline_mode<synchronous>, transform_indices = @transform_6, window_bounds = array<i64: 2, 1, 192>}, {pipeline_mode = #tpu.pipeline_mode<synchronous>, transform_indices = @transform_7, window_bounds = array<i64: 2, 64, 64>}, {pipeline_mode = #tpu.pipeline_mode<synchronous>, transform_indices = @transform_8, window_bounds = array<i64: 2, 1, 64>}, {pipeline_mode = #tpu.pipeline_mode<synchronous>, transform_indices = @transform_9, window_bounds = array<i64: 2, 1, 64>}, {pipeline_mode = #tpu.pipeline_mode<synchronous>, transform_indices = @transform_10, window_bounds = array<i64: 2, 1, 64>}, {pipeline_mode = #tpu.pipeline_mode<synchronous>, transform_indices = @transform_11, window_bounds = array<i64: 2, 64, 128>}, {pipeline_mode = #tpu.pipeline_mode<synchronous>, transform_indices = @transform_12, window_bounds = array<i64: 2, 1, 128>}, {pipeline_mode = #tpu.pipeline_mode<synchronous>, transform_indices = @transform_13, window_bounds = array<i64: 2, 128, 64>}, {pipeline_mode = #tpu.pipeline_mode<synchronous>, transform_indices = @transform_14, window_bounds = array<i64: 2, 1, 64>}, {pipeline_mode = #tpu.pipeline_mode<synchronous>, transform_indices = @transform_15, window_bounds = array<i64: 2, 1, 64>}, {pipeline_mode = #tpu.pipeline_mode<synchronous>, transform_indices = @transform_16, window_bounds = array<i64: 2, 1, 64>}, {pipeline_mode = #tpu.pipeline_mode<synchronous>, transform_indices = @transform_17, window_bounds = array<i64: 64, 64>}, {pipeline_mode = #tpu.pipeline_mode<synchronous>, transform_indices = @transform_18, window_bounds = array<i64: 1, 64>}, {pipeline_mode = #tpu.pipeline_mode<synchronous>, transform_indices = @transform_19, window_bounds = array<i64: 64, 2>}, {pipeline_mode = #tpu.pipeline_mode<synchronous>, transform_indices = @transform_20, window_bounds = array<i64: 1, 2>}, {pipeline_mode = #tpu.pipeline_mode<synchronous>, transform_indices = @transform_21, window_bounds = array<i64: 1, 2>}, {pipeline_mode = #tpu.pipeline_mode<synchronous>, transform_indices = @transform_22, window_bounds = array<i64: 2, 2>}]} {
    %c0 = arith.constant 0 : index
    %c0_0 = arith.constant 0 : index
    %0 = vector.load %arg2[%c0, %c0_0] : memref<2x8xf32, #tpu.memory_space<vmem>>, vector<2x8xf32>
    %1 = vector.shape_cast %0 : vector<2x8xf32> to vector<2x1x8xf32>
    %cst = arith.constant 1.000000e+00 : f32
    %2 = vector.broadcast %cst : f32 to vector<2x1x8xf32>
    %3 = arith.subf %1, %2 : vector<2x1x8xf32>
    %cst_1 = arith.constant 1.000000e+09 : f32
    %4 = vector.broadcast %cst_1 : f32 to vector<2x1x8xf32>
    %5 = arith.mulf %3, %4 : vector<2x1x8xf32>
    %6 = tpu.concatenate %5, %5 in 0 : vector<2x1x8xf32>, vector<2x1x8xf32> -> vector<4x1x8xf32>
    %7 = vector.shape_cast %6 : vector<4x1x8xf32> to vector<4x1x8xf32>
    %8 = vector.broadcast %7 : vector<4x1x8xf32> to vector<4x8x8xf32>
    %c0_2 = arith.constant 0 : index
    %c0_3 = arith.constant 0 : index
    %9 = vector.load %arg1[%c0_2, %c0_3] : memref<16x64xf32, #tpu.memory_space<vmem>>, vector<16x64xf32>
    %c0_4 = arith.constant 0 : index
    %c0_5 = arith.constant 0 : index
    %10 = vector.load %arg4[%c0_4, %c0_5] : memref<1x64xf32, #tpu.memory_space<vmem>>, vector<1x64xf32>
    %c0_6 = arith.constant 0 : index
    %c0_7 = arith.constant 0 : index
    %11 = vector.load %arg5[%c0_6, %c0_7] : memref<1x64xf32, #tpu.memory_space<vmem>>, vector<1x64xf32>
    %cst_8 = arith.constant dense<0.000000e+00> : vector<16xf32>
    %12 = vector.multi_reduction <add>, %9, %cst_8 [1] : vector<16x64xf32> to vector<16xf32>
    %13 = vector.shape_cast %12 : vector<16xf32> to vector<16x1xf32>
    %cst_9 = arith.constant 6.400000e+01 : f32
    %14 = vector.broadcast %cst_9 : f32 to vector<16x1xf32>
    %15 = arith.divf %13, %14 : vector<16x1xf32>
    %16 = vector.broadcast %15 : vector<16x1xf32> to vector<16x64xf32>
    %17 = arith.subf %9, %16 : vector<16x64xf32>
    %18 = arith.mulf %17, %17 : vector<16x64xf32>
    %cst_10 = arith.constant dense<0.000000e+00> : vector<16xf32>
    %19 = vector.multi_reduction <add>, %18, %cst_10 [1] : vector<16x64xf32> to vector<16xf32>
    %20 = vector.shape_cast %19 : vector<16xf32> to vector<16x1xf32>
    %cst_11 = arith.constant 6.400000e+01 : f32
    %21 = vector.broadcast %cst_11 : f32 to vector<16x1xf32>
    %22 = arith.divf %20, %21 : vector<16x1xf32>
    %23 = vector.broadcast %15 : vector<16x1xf32> to vector<16x64xf32>
    %24 = arith.subf %9, %23 : vector<16x64xf32>
    %cst_12 = arith.constant 9.99999996E-13 : f32
    %25 = vector.broadcast %cst_12 : f32 to vector<16x1xf32>
    %26 = arith.addf %22, %25 : vector<16x1xf32>
    %27 = math.rsqrt %26 : vector<16x1xf32>
    %28 = vector.broadcast %27 : vector<16x1xf32> to vector<16x64xf32>
    %29 = arith.mulf %24, %28 : vector<16x64xf32>
    %30 = vector.broadcast %10 : vector<1x64xf32> to vector<16x64xf32>
    %31 = arith.mulf %29, %30 : vector<16x64xf32>
    %32 = vector.broadcast %11 : vector<1x64xf32> to vector<16x64xf32>
    %33 = arith.addf %31, %32 : vector<16x64xf32>
    %c0_13 = arith.constant 0 : index
    %c0_14 = arith.constant 0 : index
    %c0_15 = arith.constant 0 : index
    %34 = vector.load %arg6[%c0_13, %c0_14, %c0_15] : memref<2x64x192xbf16, #tpu.memory_space<vmem>>, vector<1x64x192xbf16>
    %35 = vector.shape_cast %34 : vector<1x64x192xbf16> to vector<64x192xbf16>
    %c0_16 = arith.constant 0 : index
    %c0_17 = arith.constant 0 : index
    %c0_18 = arith.constant 0 : index
    %36 = vector.load %arg7[%c0_16, %c0_17, %c0_18] : memref<2x1x192xf32, #tpu.memory_space<vmem>>, vector<1x1x192xf32>
    %37 = vector.shape_cast %36 : vector<1x1x192xf32> to vector<1x192xf32>
    %38 = arith.truncf %33 : vector<16x64xf32> to vector<16x64xbf16>
    %cst_19 = arith.constant dense<0.000000e+00> : vector<16x192xf32>
    %39 = tpu.matmul %38, %35, %cst_19 {dimension_numbers = #tpu.dot_dimension_numbers<[1], [0], [0], [1], [0, 0, 1, 1], [], []>} : vector<16x64xbf16>, vector<64x192xbf16>, vector<16x192xf32> -> vector<16x192xf32>
    %40 = vector.broadcast %37 : vector<1x192xf32> to vector<16x192xf32>
    %41 = arith.addf %39, %40 : vector<16x192xf32>
    %42 = vector.shape_cast %41 : vector<16x192xf32> to vector<2x8x192xf32>
    %43 = vector.extract_strided_slice %42 {offsets = [0, 0, 0], sizes = [2, 8, 32], strides = [1, 1, 1]} : vector<2x8x192xf32> to vector<2x8x32xf32>
    %44 = vector.extract_strided_slice %42 {offsets = [0, 0, 32], sizes = [2, 8, 32], strides = [1, 1, 1]} : vector<2x8x192xf32> to vector<2x8x32xf32>
    %45 = tpu.concatenate %43, %44 in 0 : vector<2x8x32xf32>, vector<2x8x32xf32> -> vector<4x8x32xf32>
    %46 = vector.extract_strided_slice %42 {offsets = [0, 0, 64], sizes = [2, 8, 32], strides = [1, 1, 1]} : vector<2x8x192xf32> to vector<2x8x32xf32>
    %47 = vector.extract_strided_slice %42 {offsets = [0, 0, 96], sizes = [2, 8, 32], strides = [1, 1, 1]} : vector<2x8x192xf32> to vector<2x8x32xf32>
    %48 = tpu.concatenate %46, %47 in 0 : vector<2x8x32xf32>, vector<2x8x32xf32> -> vector<4x8x32xf32>
    %49 = vector.extract_strided_slice %42 {offsets = [0, 0, 128], sizes = [2, 8, 32], strides = [1, 1, 1]} : vector<2x8x192xf32> to vector<2x8x32xf32>
    %50 = vector.extract_strided_slice %42 {offsets = [0, 0, 160], sizes = [2, 8, 32], strides = [1, 1, 1]} : vector<2x8x192xf32> to vector<2x8x32xf32>
    %51 = tpu.concatenate %49, %50 in 0 : vector<2x8x32xf32>, vector<2x8x32xf32> -> vector<4x8x32xf32>
    "tpu.trace_start"() <{level = 10 : i32, message = "bqd,bkd->bqk"}> : () -> ()
    %cst_20 = arith.constant dense<0.000000e+00> : vector<4x8x8xf32>
    %52 = tpu.matmul %45, %48, %cst_20 {dimension_numbers = #tpu.dot_dimension_numbers<[2], [2], [1], [1], [0, 0, 0, 1, 1, 1], [0], [0]>} : vector<4x8x32xf32>, vector<4x8x32xf32>, vector<4x8x8xf32> -> vector<4x8x8xf32>
    "tpu.trace_stop"() : () -> ()
    %cst_21 = arith.constant 0.176776692 : f32
    %53 = vector.broadcast %cst_21 : f32 to vector<4x8x8xf32>
    %54 = arith.mulf %52, %53 : vector<4x8x8xf32>
    %55 = arith.addf %54, %8 : vector<4x8x8xf32>
    %cst_22 = arith.constant dense<0xFF800000> : vector<4x8xf32>
    %56 = vector.multi_reduction <maximumf>, %55, %cst_22 [2] : vector<4x8x8xf32> to vector<4x8xf32>
    %57 = vector.shape_cast %56 : vector<4x8xf32> to vector<4x8x1xf32>
    %58 = vector.broadcast %57 : vector<4x8x1xf32> to vector<4x8x8xf32>
    %59 = arith.subf %55, %58 : vector<4x8x8xf32>
    %60 = math.exp %59 : vector<4x8x8xf32>
    %cst_23 = arith.constant dense<0.000000e+00> : vector<4x8xf32>
    %61 = vector.multi_reduction <add>, %60, %cst_23 [2] : vector<4x8x8xf32> to vector<4x8xf32>
    %62 = vector.shape_cast %61 : vector<4x8xf32> to vector<4x8x1xf32>
    %63 = tpu.reciprocal %62 {approx = true} : vector<4x8x1xf32> -> vector<4x8x1xf32>
    %64 = vector.broadcast %63 : vector<4x8x1xf32> to vector<4x8x8xf32>
    %65 = arith.mulf %60, %64 : vector<4x8x8xf32>
    "tpu.trace_start"() <{level = 10 : i32, message = "bqk,bkd->bqd"}> : () -> ()
    %cst_24 = arith.constant dense<0.000000e+00> : vector<4x8x32xf32>
    %66 = tpu.matmul %65, %51, %cst_24 {dimension_numbers = #tpu.dot_dimension_numbers<[2], [1], [1], [2], [0, 0, 0, 1, 1, 2], [0], [0]>} : vector<4x8x8xf32>, vector<4x8x32xf32>, vector<4x8x32xf32> -> vector<4x8x32xf32>
    "tpu.trace_stop"() : () -> ()
    %67 = vector.extract_strided_slice %66 {offsets = [0, 0, 0], sizes = [2, 8, 32], strides = [1, 1, 1]} : vector<4x8x32xf32> to vector<2x8x32xf32>
    %68 = vector.extract_strided_slice %66 {offsets = [2, 0, 0], sizes = [2, 8, 32], strides = [1, 1, 1]} : vector<4x8x32xf32> to vector<2x8x32xf32>
    %69 = tpu.concatenate %67, %68 in 2 : vector<2x8x32xf32>, vector<2x8x32xf32> -> vector<2x8x64xf32>
    %70 = vector.shape_cast %69 : vector<2x8x64xf32> to vector<16x64xf32>
    %c0_25 = arith.constant 0 : index
    %c0_26 = arith.constant 0 : index
    %c0_27 = arith.constant 0 : index
    %71 = vector.load %arg8[%c0_25, %c0_26, %c0_27] : memref<2x64x64xbf16, #tpu.memory_space<vmem>>, vector<1x64x64xbf16>
    %72 = vector.shape_cast %71 : vector<1x64x64xbf16> to vector<64x64xbf16>
    %c0_28 = arith.constant 0 : index
    %c0_29 = arith.constant 0 : index
    %c0_30 = arith.constant 0 : index
    %73 = vector.load %arg9[%c0_28, %c0_29, %c0_30] : memref<2x1x64xf32, #tpu.memory_space<vmem>>, vector<1x1x64xf32>
    %74 = vector.shape_cast %73 : vector<1x1x64xf32> to vector<1x64xf32>
    %75 = arith.truncf %70 : vector<16x64xf32> to vector<16x64xbf16>
    %cst_31 = arith.constant dense<0.000000e+00> : vector<16x64xf32>
    %76 = tpu.matmul %75, %72, %cst_31 {dimension_numbers = #tpu.dot_dimension_numbers<[1], [0], [0], [1], [0, 0, 1, 1], [], []>} : vector<16x64xbf16>, vector<64x64xbf16>, vector<16x64xf32> -> vector<16x64xf32>
    %77 = vector.broadcast %74 : vector<1x64xf32> to vector<16x64xf32>
    %78 = arith.addf %76, %77 : vector<16x64xf32>
    %79 = arith.addf %33, %78 : vector<16x64xf32>
    %c0_32 = arith.constant 0 : index
    %c0_33 = arith.constant 0 : index
    %c0_34 = arith.constant 0 : index
    %80 = vector.load %arg10[%c0_32, %c0_33, %c0_34] : memref<2x1x64xf32, #tpu.memory_space<vmem>>, vector<1x1x64xf32>
    %81 = vector.shape_cast %80 : vector<1x1x64xf32> to vector<1x64xf32>
    %c0_35 = arith.constant 0 : index
    %c0_36 = arith.constant 0 : index
    %c0_37 = arith.constant 0 : index
    %82 = vector.load %arg11[%c0_35, %c0_36, %c0_37] : memref<2x1x64xf32, #tpu.memory_space<vmem>>, vector<1x1x64xf32>
    %83 = vector.shape_cast %82 : vector<1x1x64xf32> to vector<1x64xf32>
    %cst_38 = arith.constant dense<0.000000e+00> : vector<16xf32>
    %84 = vector.multi_reduction <add>, %79, %cst_38 [1] : vector<16x64xf32> to vector<16xf32>
    %85 = vector.shape_cast %84 : vector<16xf32> to vector<16x1xf32>
    %cst_39 = arith.constant 6.400000e+01 : f32
    %86 = vector.broadcast %cst_39 : f32 to vector<16x1xf32>
    %87 = arith.divf %85, %86 : vector<16x1xf32>
    %88 = vector.broadcast %87 : vector<16x1xf32> to vector<16x64xf32>
    %89 = arith.subf %79, %88 : vector<16x64xf32>
    %90 = arith.mulf %89, %89 : vector<16x64xf32>
    %cst_40 = arith.constant dense<0.000000e+00> : vector<16xf32>
    %91 = vector.multi_reduction <add>, %90, %cst_40 [1] : vector<16x64xf32> to vector<16xf32>
    %92 = vector.shape_cast %91 : vector<16xf32> to vector<16x1xf32>
    %cst_41 = arith.constant 6.400000e+01 : f32
    %93 = vector.broadcast %cst_41 : f32 to vector<16x1xf32>
    %94 = arith.divf %92, %93 : vector<16x1xf32>
    %95 = vector.broadcast %87 : vector<16x1xf32> to vector<16x64xf32>
    %96 = arith.subf %79, %95 : vector<16x64xf32>
    %cst_42 = arith.constant 9.99999996E-13 : f32
    %97 = vector.broadcast %cst_42 : f32 to vector<16x1xf32>
    %98 = arith.addf %94, %97 : vector<16x1xf32>
    %99 = math.rsqrt %98 : vector<16x1xf32>
    %100 = vector.broadcast %99 : vector<16x1xf32> to vector<16x64xf32>
    %101 = arith.mulf %96, %100 : vector<16x64xf32>
    %102 = vector.broadcast %81 : vector<1x64xf32> to vector<16x64xf32>
    %103 = arith.mulf %101, %102 : vector<16x64xf32>
    %104 = vector.broadcast %83 : vector<1x64xf32> to vector<16x64xf32>
    %105 = arith.addf %103, %104 : vector<16x64xf32>
    %c0_43 = arith.constant 0 : index
    %c0_44 = arith.constant 0 : index
    %c0_45 = arith.constant 0 : index
    %106 = vector.load %arg12[%c0_43, %c0_44, %c0_45] : memref<2x64x128xbf16, #tpu.memory_space<vmem>>, vector<1x64x128xbf16>
    %107 = vector.shape_cast %106 : vector<1x64x128xbf16> to vector<64x128xbf16>
    %c0_46 = arith.constant 0 : index
    %c0_47 = arith.constant 0 : index
    %c0_48 = arith.constant 0 : index
    %108 = vector.load %arg13[%c0_46, %c0_47, %c0_48] : memref<2x1x128xf32, #tpu.memory_space<vmem>>, vector<1x1x128xf32>
    %109 = vector.shape_cast %108 : vector<1x1x128xf32> to vector<1x128xf32>
    %110 = arith.truncf %105 : vector<16x64xf32> to vector<16x64xbf16>
    %cst_49 = arith.constant dense<0.000000e+00> : vector<16x128xf32>
    %111 = tpu.matmul %110, %107, %cst_49 {dimension_numbers = #tpu.dot_dimension_numbers<[1], [0], [0], [1], [0, 0, 1, 1], [], []>} : vector<16x64xbf16>, vector<64x128xbf16>, vector<16x128xf32> -> vector<16x128xf32>
    %112 = vector.broadcast %109 : vector<1x128xf32> to vector<16x128xf32>
    %113 = arith.addf %111, %112 : vector<16x128xf32>
    %114 = arith.mulf %113, %113 : vector<16x128xf32>
    %115 = arith.mulf %113, %114 : vector<16x128xf32>
    %cst_50 = arith.constant 4.471500e-02 : f32
    %116 = vector.broadcast %cst_50 : f32 to vector<16x128xf32>
    %117 = arith.mulf %116, %115 : vector<16x128xf32>
    %118 = arith.addf %113, %117 : vector<16x128xf32>
    %cst_51 = arith.constant 0.797884583 : f32
    %119 = vector.broadcast %cst_51 : f32 to vector<16x128xf32>
    %120 = arith.mulf %119, %118 : vector<16x128xf32>
    %121 = math.tanh %120 : vector<16x128xf32>
    %cst_52 = arith.constant 1.000000e+00 : f32
    %122 = vector.broadcast %cst_52 : f32 to vector<16x128xf32>
    %123 = arith.addf %122, %121 : vector<16x128xf32>
    %cst_53 = arith.constant 5.000000e-01 : f32
    %124 = vector.broadcast %cst_53 : f32 to vector<16x128xf32>
    %125 = arith.mulf %124, %123 : vector<16x128xf32>
    %126 = arith.mulf %113, %125 : vector<16x128xf32>
    %c0_54 = arith.constant 0 : index
    %c0_55 = arith.constant 0 : index
    %c0_56 = arith.constant 0 : index
    %127 = vector.load %arg14[%c0_54, %c0_55, %c0_56] : memref<2x128x64xbf16, #tpu.memory_space<vmem>>, vector<1x128x64xbf16>
    %128 = vector.shape_cast %127 : vector<1x128x64xbf16> to vector<128x64xbf16>
    %c0_57 = arith.constant 0 : index
    %c0_58 = arith.constant 0 : index
    %c0_59 = arith.constant 0 : index
    %129 = vector.load %arg15[%c0_57, %c0_58, %c0_59] : memref<2x1x64xf32, #tpu.memory_space<vmem>>, vector<1x1x64xf32>
    %130 = vector.shape_cast %129 : vector<1x1x64xf32> to vector<1x64xf32>
    %131 = arith.truncf %126 : vector<16x128xf32> to vector<16x128xbf16>
    %cst_60 = arith.constant dense<0.000000e+00> : vector<16x64xf32>
    %132 = tpu.matmul %131, %128, %cst_60 {dimension_numbers = #tpu.dot_dimension_numbers<[1], [0], [0], [1], [0, 0, 1, 1], [], []>} : vector<16x128xbf16>, vector<128x64xbf16>, vector<16x64xf32> -> vector<16x64xf32>
    %133 = vector.broadcast %130 : vector<1x64xf32> to vector<16x64xf32>
    %134 = arith.addf %132, %133 : vector<16x64xf32>
    %135 = arith.addf %105, %134 : vector<16x64xf32>
    %c0_61 = arith.constant 0 : index
    %c0_62 = arith.constant 0 : index
    %c0_63 = arith.constant 0 : index
    %136 = vector.load %arg16[%c0_61, %c0_62, %c0_63] : memref<2x1x64xf32, #tpu.memory_space<vmem>>, vector<1x1x64xf32>
    %137 = vector.shape_cast %136 : vector<1x1x64xf32> to vector<1x64xf32>
    %c0_64 = arith.constant 0 : index
    %c0_65 = arith.constant 0 : index
    %c0_66 = arith.constant 0 : index
    %138 = vector.load %arg17[%c0_64, %c0_65, %c0_66] : memref<2x1x64xf32, #tpu.memory_space<vmem>>, vector<1x1x64xf32>
    %139 = vector.shape_cast %138 : vector<1x1x64xf32> to vector<1x64xf32>
    %cst_67 = arith.constant dense<0.000000e+00> : vector<16xf32>
    %140 = vector.multi_reduction <add>, %135, %cst_67 [1] : vector<16x64xf32> to vector<16xf32>
    %141 = vector.shape_cast %140 : vector<16xf32> to vector<16x1xf32>
    %cst_68 = arith.constant 6.400000e+01 : f32
    %142 = vector.broadcast %cst_68 : f32 to vector<16x1xf32>
    %143 = arith.divf %141, %142 : vector<16x1xf32>
    %144 = vector.broadcast %143 : vector<16x1xf32> to vector<16x64xf32>
    %145 = arith.subf %135, %144 : vector<16x64xf32>
    %146 = arith.mulf %145, %145 : vector<16x64xf32>
    %cst_69 = arith.constant dense<0.000000e+00> : vector<16xf32>
    %147 = vector.multi_reduction <add>, %146, %cst_69 [1] : vector<16x64xf32> to vector<16xf32>
    %148 = vector.shape_cast %147 : vector<16xf32> to vector<16x1xf32>
    %cst_70 = arith.constant 6.400000e+01 : f32
    %149 = vector.broadcast %cst_70 : f32 to vector<16x1xf32>
    %150 = arith.divf %148, %149 : vector<16x1xf32>
    %151 = vector.broadcast %143 : vector<16x1xf32> to vector<16x64xf32>
    %152 = arith.subf %135, %151 : vector<16x64xf32>
    %cst_71 = arith.constant 9.99999996E-13 : f32
    %153 = vector.broadcast %cst_71 : f32 to vector<16x1xf32>
    %154 = arith.addf %150, %153 : vector<16x1xf32>
    %155 = math.rsqrt %154 : vector<16x1xf32>
    %156 = vector.broadcast %155 : vector<16x1xf32> to vector<16x64xf32>
    %157 = arith.mulf %152, %156 : vector<16x64xf32>
    %158 = vector.broadcast %137 : vector<1x64xf32> to vector<16x64xf32>
    %159 = arith.mulf %157, %158 : vector<16x64xf32>
    %160 = vector.broadcast %139 : vector<1x64xf32> to vector<16x64xf32>
    %161 = arith.addf %159, %160 : vector<16x64xf32>
    %c1 = arith.constant 1 : index
    %c0_72 = arith.constant 0 : index
    %c0_73 = arith.constant 0 : index
    %162 = vector.load %arg6[%c1, %c0_72, %c0_73] : memref<2x64x192xbf16, #tpu.memory_space<vmem>>, vector<1x64x192xbf16>
    %163 = vector.shape_cast %162 : vector<1x64x192xbf16> to vector<64x192xbf16>
    %c1_74 = arith.constant 1 : index
    %c0_75 = arith.constant 0 : index
    %c0_76 = arith.constant 0 : index
    %164 = vector.load %arg7[%c1_74, %c0_75, %c0_76] : memref<2x1x192xf32, #tpu.memory_space<vmem>>, vector<1x1x192xf32>
    %165 = vector.shape_cast %164 : vector<1x1x192xf32> to vector<1x192xf32>
    %166 = arith.truncf %161 : vector<16x64xf32> to vector<16x64xbf16>
    %cst_77 = arith.constant dense<0.000000e+00> : vector<16x192xf32>
    %167 = tpu.matmul %166, %163, %cst_77 {dimension_numbers = #tpu.dot_dimension_numbers<[1], [0], [0], [1], [0, 0, 1, 1], [], []>} : vector<16x64xbf16>, vector<64x192xbf16>, vector<16x192xf32> -> vector<16x192xf32>
    %168 = vector.broadcast %165 : vector<1x192xf32> to vector<16x192xf32>
    %169 = arith.addf %167, %168 : vector<16x192xf32>
    %170 = vector.shape_cast %169 : vector<16x192xf32> to vector<2x8x192xf32>
    %171 = vector.extract_strided_slice %170 {offsets = [0, 0, 0], sizes = [2, 8, 32], strides = [1, 1, 1]} : vector<2x8x192xf32> to vector<2x8x32xf32>
    %172 = vector.extract_strided_slice %170 {offsets = [0, 0, 32], sizes = [2, 8, 32], strides = [1, 1, 1]} : vector<2x8x192xf32> to vector<2x8x32xf32>
    %173 = tpu.concatenate %171, %172 in 0 : vector<2x8x32xf32>, vector<2x8x32xf32> -> vector<4x8x32xf32>
    %174 = vector.extract_strided_slice %170 {offsets = [0, 0, 64], sizes = [2, 8, 32], strides = [1, 1, 1]} : vector<2x8x192xf32> to vector<2x8x32xf32>
    %175 = vector.extract_strided_slice %170 {offsets = [0, 0, 96], sizes = [2, 8, 32], strides = [1, 1, 1]} : vector<2x8x192xf32> to vector<2x8x32xf32>
    %176 = tpu.concatenate %174, %175 in 0 : vector<2x8x32xf32>, vector<2x8x32xf32> -> vector<4x8x32xf32>
    %177 = vector.extract_strided_slice %170 {offsets = [0, 0, 128], sizes = [2, 8, 32], strides = [1, 1, 1]} : vector<2x8x192xf32> to vector<2x8x32xf32>
    %178 = vector.extract_strided_slice %170 {offsets = [0, 0, 160], sizes = [2, 8, 32], strides = [1, 1, 1]} : vector<2x8x192xf32> to vector<2x8x32xf32>
    %179 = tpu.concatenate %177, %178 in 0 : vector<2x8x32xf32>, vector<2x8x32xf32> -> vector<4x8x32xf32>
    "tpu.trace_start"() <{level = 10 : i32, message = "bqd,bkd->bqk"}> : () -> ()
    %cst_78 = arith.constant dense<0.000000e+00> : vector<4x8x8xf32>
    %180 = tpu.matmul %173, %176, %cst_78 {dimension_numbers = #tpu.dot_dimension_numbers<[2], [2], [1], [1], [0, 0, 0, 1, 1, 1], [0], [0]>} : vector<4x8x32xf32>, vector<4x8x32xf32>, vector<4x8x8xf32> -> vector<4x8x8xf32>
    "tpu.trace_stop"() : () -> ()
    %cst_79 = arith.constant 0.176776692 : f32
    %181 = vector.broadcast %cst_79 : f32 to vector<4x8x8xf32>
    %182 = arith.mulf %180, %181 : vector<4x8x8xf32>
    %183 = arith.addf %182, %8 : vector<4x8x8xf32>
    %cst_80 = arith.constant dense<0xFF800000> : vector<4x8xf32>
    %184 = vector.multi_reduction <maximumf>, %183, %cst_80 [2] : vector<4x8x8xf32> to vector<4x8xf32>
    %185 = vector.shape_cast %184 : vector<4x8xf32> to vector<4x8x1xf32>
    %186 = vector.broadcast %185 : vector<4x8x1xf32> to vector<4x8x8xf32>
    %187 = arith.subf %183, %186 : vector<4x8x8xf32>
    %188 = math.exp %187 : vector<4x8x8xf32>
    %cst_81 = arith.constant dense<0.000000e+00> : vector<4x8xf32>
    %189 = vector.multi_reduction <add>, %188, %cst_81 [2] : vector<4x8x8xf32> to vector<4x8xf32>
    %190 = vector.shape_cast %189 : vector<4x8xf32> to vector<4x8x1xf32>
    %191 = tpu.reciprocal %190 {approx = true} : vector<4x8x1xf32> -> vector<4x8x1xf32>
    %192 = vector.broadcast %191 : vector<4x8x1xf32> to vector<4x8x8xf32>
    %193 = arith.mulf %188, %192 : vector<4x8x8xf32>
    "tpu.trace_start"() <{level = 10 : i32, message = "bqk,bkd->bqd"}> : () -> ()
    %cst_82 = arith.constant dense<0.000000e+00> : vector<4x8x32xf32>
    %194 = tpu.matmul %193, %179, %cst_82 {dimension_numbers = #tpu.dot_dimension_numbers<[2], [1], [1], [2], [0, 0, 0, 1, 1, 2], [0], [0]>} : vector<4x8x8xf32>, vector<4x8x32xf32>, vector<4x8x32xf32> -> vector<4x8x32xf32>
    "tpu.trace_stop"() : () -> ()
    %195 = vector.extract_strided_slice %194 {offsets = [0, 0, 0], sizes = [2, 8, 32], strides = [1, 1, 1]} : vector<4x8x32xf32> to vector<2x8x32xf32>
    %196 = vector.extract_strided_slice %194 {offsets = [2, 0, 0], sizes = [2, 8, 32], strides = [1, 1, 1]} : vector<4x8x32xf32> to vector<2x8x32xf32>
    %197 = tpu.concatenate %195, %196 in 2 : vector<2x8x32xf32>, vector<2x8x32xf32> -> vector<2x8x64xf32>
    %198 = vector.shape_cast %197 : vector<2x8x64xf32> to vector<16x64xf32>
    %c1_83 = arith.constant 1 : index
    %c0_84 = arith.constant 0 : index
    %c0_85 = arith.constant 0 : index
    %199 = vector.load %arg8[%c1_83, %c0_84, %c0_85] : memref<2x64x64xbf16, #tpu.memory_space<vmem>>, vector<1x64x64xbf16>
    %200 = vector.shape_cast %199 : vector<1x64x64xbf16> to vector<64x64xbf16>
    %c1_86 = arith.constant 1 : index
    %c0_87 = arith.constant 0 : index
    %c0_88 = arith.constant 0 : index
    %201 = vector.load %arg9[%c1_86, %c0_87, %c0_88] : memref<2x1x64xf32, #tpu.memory_space<vmem>>, vector<1x1x64xf32>
    %202 = vector.shape_cast %201 : vector<1x1x64xf32> to vector<1x64xf32>
    %203 = arith.truncf %198 : vector<16x64xf32> to vector<16x64xbf16>
    %cst_89 = arith.constant dense<0.000000e+00> : vector<16x64xf32>
    %204 = tpu.matmul %203, %200, %cst_89 {dimension_numbers = #tpu.dot_dimension_numbers<[1], [0], [0], [1], [0, 0, 1, 1], [], []>} : vector<16x64xbf16>, vector<64x64xbf16>, vector<16x64xf32> -> vector<16x64xf32>
    %205 = vector.broadcast %202 : vector<1x64xf32> to vector<16x64xf32>
    %206 = arith.addf %204, %205 : vector<16x64xf32>
    %207 = arith.addf %161, %206 : vector<16x64xf32>
    %c1_90 = arith.constant 1 : index
    %c0_91 = arith.constant 0 : index
    %c0_92 = arith.constant 0 : index
    %208 = vector.load %arg10[%c1_90, %c0_91, %c0_92] : memref<2x1x64xf32, #tpu.memory_space<vmem>>, vector<1x1x64xf32>
    %209 = vector.shape_cast %208 : vector<1x1x64xf32> to vector<1x64xf32>
    %c1_93 = arith.constant 1 : index
    %c0_94 = arith.constant 0 : index
    %c0_95 = arith.constant 0 : index
    %210 = vector.load %arg11[%c1_93, %c0_94, %c0_95] : memref<2x1x64xf32, #tpu.memory_space<vmem>>, vector<1x1x64xf32>
    %211 = vector.shape_cast %210 : vector<1x1x64xf32> to vector<1x64xf32>
    %cst_96 = arith.constant dense<0.000000e+00> : vector<16xf32>
    %212 = vector.multi_reduction <add>, %207, %cst_96 [1] : vector<16x64xf32> to vector<16xf32>
    %213 = vector.shape_cast %212 : vector<16xf32> to vector<16x1xf32>
    %cst_97 = arith.constant 6.400000e+01 : f32
    %214 = vector.broadcast %cst_97 : f32 to vector<16x1xf32>
    %215 = arith.divf %213, %214 : vector<16x1xf32>
    %216 = vector.broadcast %215 : vector<16x1xf32> to vector<16x64xf32>
    %217 = arith.subf %207, %216 : vector<16x64xf32>
    %218 = arith.mulf %217, %217 : vector<16x64xf32>
    %cst_98 = arith.constant dense<0.000000e+00> : vector<16xf32>
    %219 = vector.multi_reduction <add>, %218, %cst_98 [1] : vector<16x64xf32> to vector<16xf32>
    %220 = vector.shape_cast %219 : vector<16xf32> to vector<16x1xf32>
    %cst_99 = arith.constant 6.400000e+01 : f32
    %221 = vector.broadcast %cst_99 : f32 to vector<16x1xf32>
    %222 = arith.divf %220, %221 : vector<16x1xf32>
    %223 = vector.broadcast %215 : vector<16x1xf32> to vector<16x64xf32>
    %224 = arith.subf %207, %223 : vector<16x64xf32>
    %cst_100 = arith.constant 9.99999996E-13 : f32
    %225 = vector.broadcast %cst_100 : f32 to vector<16x1xf32>
    %226 = arith.addf %222, %225 : vector<16x1xf32>
    %227 = math.rsqrt %226 : vector<16x1xf32>
    %228 = vector.broadcast %227 : vector<16x1xf32> to vector<16x64xf32>
    %229 = arith.mulf %224, %228 : vector<16x64xf32>
    %230 = vector.broadcast %209 : vector<1x64xf32> to vector<16x64xf32>
    %231 = arith.mulf %229, %230 : vector<16x64xf32>
    %232 = vector.broadcast %211 : vector<1x64xf32> to vector<16x64xf32>
    %233 = arith.addf %231, %232 : vector<16x64xf32>
    %c1_101 = arith.constant 1 : index
    %c0_102 = arith.constant 0 : index
    %c0_103 = arith.constant 0 : index
    %234 = vector.load %arg12[%c1_101, %c0_102, %c0_103] : memref<2x64x128xbf16, #tpu.memory_space<vmem>>, vector<1x64x128xbf16>
    %235 = vector.shape_cast %234 : vector<1x64x128xbf16> to vector<64x128xbf16>
    %c1_104 = arith.constant 1 : index
    %c0_105 = arith.constant 0 : index
    %c0_106 = arith.constant 0 : index
    %236 = vector.load %arg13[%c1_104, %c0_105, %c0_106] : memref<2x1x128xf32, #tpu.memory_space<vmem>>, vector<1x1x128xf32>
    %237 = vector.shape_cast %236 : vector<1x1x128xf32> to vector<1x128xf32>
    %238 = arith.truncf %233 : vector<16x64xf32> to vector<16x64xbf16>
    %cst_107 = arith.constant dense<0.000000e+00> : vector<16x128xf32>
    %239 = tpu.matmul %238, %235, %cst_107 {dimension_numbers = #tpu.dot_dimension_numbers<[1], [0], [0], [1], [0, 0, 1, 1], [], []>} : vector<16x64xbf16>, vector<64x128xbf16>, vector<16x128xf32> -> vector<16x128xf32>
    %240 = vector.broadcast %237 : vector<1x128xf32> to vector<16x128xf32>
    %241 = arith.addf %239, %240 : vector<16x128xf32>
    %242 = arith.mulf %241, %241 : vector<16x128xf32>
    %243 = arith.mulf %241, %242 : vector<16x128xf32>
    %cst_108 = arith.constant 4.471500e-02 : f32
    %244 = vector.broadcast %cst_108 : f32 to vector<16x128xf32>
    %245 = arith.mulf %244, %243 : vector<16x128xf32>
    %246 = arith.addf %241, %245 : vector<16x128xf32>
    %cst_109 = arith.constant 0.797884583 : f32
    %247 = vector.broadcast %cst_109 : f32 to vector<16x128xf32>
    %248 = arith.mulf %247, %246 : vector<16x128xf32>
    %249 = math.tanh %248 : vector<16x128xf32>
    %cst_110 = arith.constant 1.000000e+00 : f32
    %250 = vector.broadcast %cst_110 : f32 to vector<16x128xf32>
    %251 = arith.addf %250, %249 : vector<16x128xf32>
    %cst_111 = arith.constant 5.000000e-01 : f32
    %252 = vector.broadcast %cst_111 : f32 to vector<16x128xf32>
    %253 = arith.mulf %252, %251 : vector<16x128xf32>
    %254 = arith.mulf %241, %253 : vector<16x128xf32>
    %c1_112 = arith.constant 1 : index
    %c0_113 = arith.constant 0 : index
    %c0_114 = arith.constant 0 : index
    %255 = vector.load %arg14[%c1_112, %c0_113, %c0_114] : memref<2x128x64xbf16, #tpu.memory_space<vmem>>, vector<1x128x64xbf16>
    %256 = vector.shape_cast %255 : vector<1x128x64xbf16> to vector<128x64xbf16>
    %c1_115 = arith.constant 1 : index
    %c0_116 = arith.constant 0 : index
    %c0_117 = arith.constant 0 : index
    %257 = vector.load %arg15[%c1_115, %c0_116, %c0_117] : memref<2x1x64xf32, #tpu.memory_space<vmem>>, vector<1x1x64xf32>
    %258 = vector.shape_cast %257 : vector<1x1x64xf32> to vector<1x64xf32>
    %259 = arith.truncf %254 : vector<16x128xf32> to vector<16x128xbf16>
    %cst_118 = arith.constant dense<0.000000e+00> : vector<16x64xf32>
    %260 = tpu.matmul %259, %256, %cst_118 {dimension_numbers = #tpu.dot_dimension_numbers<[1], [0], [0], [1], [0, 0, 1, 1], [], []>} : vector<16x128xbf16>, vector<128x64xbf16>, vector<16x64xf32> -> vector<16x64xf32>
    %261 = vector.broadcast %258 : vector<1x64xf32> to vector<16x64xf32>
    %262 = arith.addf %260, %261 : vector<16x64xf32>
    %263 = arith.addf %233, %262 : vector<16x64xf32>
    %c1_119 = arith.constant 1 : index
    %c0_120 = arith.constant 0 : index
    %c0_121 = arith.constant 0 : index
    %264 = vector.load %arg16[%c1_119, %c0_120, %c0_121] : memref<2x1x64xf32, #tpu.memory_space<vmem>>, vector<1x1x64xf32>
    %265 = vector.shape_cast %264 : vector<1x1x64xf32> to vector<1x64xf32>
    %c1_122 = arith.constant 1 : index
    %c0_123 = arith.constant 0 : index
    %c0_124 = arith.constant 0 : index
    %266 = vector.load %arg17[%c1_122, %c0_123, %c0_124] : memref<2x1x64xf32, #tpu.memory_space<vmem>>, vector<1x1x64xf32>
    %267 = vector.shape_cast %266 : vector<1x1x64xf32> to vector<1x64xf32>
    %cst_125 = arith.constant dense<0.000000e+00> : vector<16xf32>
    %268 = vector.multi_reduction <add>, %263, %cst_125 [1] : vector<16x64xf32> to vector<16xf32>
    %269 = vector.shape_cast %268 : vector<16xf32> to vector<16x1xf32>
    %cst_126 = arith.constant 6.400000e+01 : f32
    %270 = vector.broadcast %cst_126 : f32 to vector<16x1xf32>
    %271 = arith.divf %269, %270 : vector<16x1xf32>
    %272 = vector.broadcast %271 : vector<16x1xf32> to vector<16x64xf32>
    %273 = arith.subf %263, %272 : vector<16x64xf32>
    %274 = arith.mulf %273, %273 : vector<16x64xf32>
    %cst_127 = arith.constant dense<0.000000e+00> : vector<16xf32>
    %275 = vector.multi_reduction <add>, %274, %cst_127 [1] : vector<16x64xf32> to vector<16xf32>
    %276 = vector.shape_cast %275 : vector<16xf32> to vector<16x1xf32>
    %cst_128 = arith.constant 6.400000e+01 : f32
    %277 = vector.broadcast %cst_128 : f32 to vector<16x1xf32>
    %278 = arith.divf %276, %277 : vector<16x1xf32>
    %279 = vector.broadcast %271 : vector<16x1xf32> to vector<16x64xf32>
    %280 = arith.subf %263, %279 : vector<16x64xf32>
    %cst_129 = arith.constant 9.99999996E-13 : f32
    %281 = vector.broadcast %cst_129 : f32 to vector<16x1xf32>
    %282 = arith.addf %278, %281 : vector<16x1xf32>
    %283 = math.rsqrt %282 : vector<16x1xf32>
    %284 = vector.broadcast %283 : vector<16x1xf32> to vector<16x64xf32>
    %285 = arith.mulf %280, %284 : vector<16x64xf32>
    %286 = vector.broadcast %265 : vector<1x64xf32> to vector<16x64xf32>
    %287 = arith.mulf %285, %286 : vector<16x64xf32>
    %288 = vector.broadcast %267 : vector<1x64xf32> to vector<16x64xf32>
    %289 = arith.addf %287, %288 : vector<16x64xf32>
    %290 = vector.shape_cast %289 : vector<16x64xf32> to vector<2x8x64xf32>
    %291 = vector.extract_strided_slice %290 {offsets = [0, 0, 0], sizes = [2, 1, 64], strides = [1, 1, 1]} : vector<2x8x64xf32> to vector<2x1x64xf32>
    %292 = vector.shape_cast %291 : vector<2x1x64xf32> to vector<2x64xf32>
    %c0_130 = arith.constant 0 : index
    %c0_131 = arith.constant 0 : index
    %293 = vector.load %arg18[%c0_130, %c0_131] : memref<64x64xbf16, #tpu.memory_space<vmem>>, vector<64x64xbf16>
    %c0_132 = arith.constant 0 : index
    %c0_133 = arith.constant 0 : index
    %294 = vector.load %arg19[%c0_132, %c0_133] : memref<1x64xf32, #tpu.memory_space<vmem>>, vector<1x64xf32>
    %295 = arith.truncf %292 : vector<2x64xf32> to vector<2x64xbf16>
    %cst_134 = arith.constant dense<0.000000e+00> : vector<2x64xf32>
    %296 = tpu.matmul %295, %293, %cst_134 {dimension_numbers = #tpu.dot_dimension_numbers<[1], [0], [0], [1], [0, 0, 1, 1], [], []>} : vector<2x64xbf16>, vector<64x64xbf16>, vector<2x64xf32> -> vector<2x64xf32>
    %297 = vector.broadcast %294 : vector<1x64xf32> to vector<2x64xf32>
    %298 = arith.addf %296, %297 : vector<2x64xf32>
    %cst_135 = arith.constant 0.000000e+00 : f32
    %299 = vector.broadcast %cst_135 : f32 to vector<2x64xf32>
    %300 = arith.maximumf %298, %299 : vector<2x64xf32>
    %c0_136 = arith.constant 0 : index
    %c0_137 = arith.constant 0 : index
    %301 = vector.load %arg20[%c0_136, %c0_137] : memref<64x2xf32, #tpu.memory_space<vmem>>, vector<64x2xf32>
    %cst_138 = arith.constant dense<0.000000e+00> : vector<2x2xf32>
    %302 = tpu.matmul %300, %301, %cst_138 {dimension_numbers = #tpu.dot_dimension_numbers<[1], [0], [0], [1], [0, 0, 1, 1], [], []>} : vector<2x64xf32>, vector<64x2xf32>, vector<2x2xf32> -> vector<2x2xf32>
    %c0_139 = arith.constant 0 : index
    %c0_140 = arith.constant 0 : index
    %303 = vector.load %arg3[%c0_139, %c0_140] : memref<2x1xf32, #tpu.memory_space<vmem>>, vector<2x1xf32>
    %c0_141 = arith.constant 0 : index
    %c0_142 = arith.constant 0 : index
    %304 = vector.load %arg21[%c0_141, %c0_142] : memref<1x2xf32, #tpu.memory_space<vmem>>, vector<1x2xf32>
    %305 = vector.broadcast %303 : vector<2x1xf32> to vector<2x2xf32>
    %306 = vector.broadcast %304 : vector<1x2xf32> to vector<2x2xf32>
    %307 = arith.mulf %305, %306 : vector<2x2xf32>
    %308 = arith.addf %302, %307 : vector<2x2xf32>
    %c0_143 = arith.constant 0 : index
    %c0_144 = arith.constant 0 : index
    %309 = vector.load %arg22[%c0_143, %c0_144] : memref<1x2xf32, #tpu.memory_space<vmem>>, vector<1x2xf32>
    %310 = vector.broadcast %309 : vector<1x2xf32> to vector<2x2xf32>
    %311 = arith.addf %308, %310 : vector<2x2xf32>
    %c0_145 = arith.constant 0 : index
    %c0_146 = arith.constant 0 : index
    %312 = vector.load %arg23[%c0_145, %c0_146] : memref<2x2xf32, #tpu.memory_space<vmem>>, vector<2x2xf32>
    tpu.vector_store %arg23[%c0_145, %c0_146], %311 {strides = array<i32>} : memref<2x2xf32, #tpu.memory_space<vmem>>, vector<2x2xf32>,
    return
  }
  func.func @transform_0(%arg0: i32) -> (i32, i32) {
    %c0_i32 = arith.constant 0 : i32
    %c0_i32_0 = arith.constant 0 : i32
    %c0_i32_1 = arith.constant 0 : i32
    return %c0_i32, %c0_i32_0 : i32, i32
  }
  func.func @transform_1(%arg0: i32) -> (i32, i32) {
    %c0_i32 = arith.constant 0 : i32
    %c0_i32_0 = arith.constant 0 : i32
    %c0_i32_1 = arith.constant 0 : i32
    return %c0_i32, %c0_i32_0 : i32, i32
  }
  func.func @transform_2(%arg0: i32) -> (i32, i32) {
    %c0_i32 = arith.constant 0 : i32
    %c0_i32_0 = arith.constant 0 : i32
    %c0_i32_1 = arith.constant 0 : i32
    return %c0_i32, %c0_i32_0 : i32, i32
  }
  func.func @transform_3(%arg0: i32) -> (i32, i32) {
    %c0_i32 = arith.constant 0 : i32
    %c0_i32_0 = arith.constant 0 : i32
    %c0_i32_1 = arith.constant 0 : i32
    return %c0_i32, %c0_i32_0 : i32, i32
  }
  func.func @transform_4(%arg0: i32) -> (i32, i32) {
    %c0_i32 = arith.constant 0 : i32
    %c0_i32_0 = arith.constant 0 : i32
    %c0_i32_1 = arith.constant 0 : i32
    return %c0_i32, %c0_i32_0 : i32, i32
  }
  func.func @transform_5(%arg0: i32) -> (i32, i32, i32) {
    %c0_i32 = arith.constant 0 : i32
    %c0_i32_0 = arith.constant 0 : i32
    %c0_i32_1 = arith.constant 0 : i32
    %c0_i32_2 = arith.constant 0 : i32
    return %c0_i32, %c0_i32_0, %c0_i32_1 : i32, i32, i32
  }
  func.func @transform_6(%arg0: i32) -> (i32, i32, i32) {
    %c0_i32 = arith.constant 0 : i32
    %c0_i32_0 = arith.constant 0 : i32
    %c0_i32_1 = arith.constant 0 : i32
    %c0_i32_2 = arith.constant 0 : i32
    return %c0_i32, %c0_i32_0, %c0_i32_1 : i32, i32, i32
  }
  func.func @transform_7(%arg0: i32) -> (i32, i32, i32) {
    %c0_i32 = arith.constant 0 : i32
    %c0_i32_0 = arith.constant 0 : i32
    %c0_i32_1 = arith.constant 0 : i32
    %c0_i32_2 = arith.constant 0 : i32
    return %c0_i32, %c0_i32_0, %c0_i32_1 : i32, i32, i32
  }
  func.func @transform_8(%arg0: i32) -> (i32, i32, i32) {
    %c0_i32 = arith.constant 0 : i32
    %c0_i32_0 = arith.constant 0 : i32
    %c0_i32_1 = arith.constant 0 : i32
    %c0_i32_2 = arith.constant 0 : i32
    return %c0_i32, %c0_i32_0, %c0_i32_1 : i32, i32, i32
  }
  func.func @transform_9(%arg0: i32) -> (i32, i32, i32) {
    %c0_i32 = arith.constant 0 : i32
    %c0_i32_0 = arith.constant 0 : i32
    %c0_i32_1 = arith.constant 0 : i32
    %c0_i32_2 = arith.constant 0 : i32
    return %c0_i32, %c0_i32_0, %c0_i32_1 : i32, i32, i32
  }
  func.func @transform_10(%arg0: i32) -> (i32, i32, i32) {
    %c0_i32 = arith.constant 0 : i32
    %c0_i32_0 = arith.constant 0 : i32
    %c0_i32_1 = arith.constant 0 : i32
    %c0_i32_2 = arith.constant 0 : i32
    return %c0_i32, %c0_i32_0, %c0_i32_1 : i32, i32, i32
  }
  func.func @transform_11(%arg0: i32) -> (i32, i32, i32) {
    %c0_i32 = arith.constant 0 : i32
    %c0_i32_0 = arith.constant 0 : i32
    %c0_i32_1 = arith.constant 0 : i32
    %c0_i32_2 = arith.constant 0 : i32
    return %c0_i32, %c0_i32_0, %c0_i32_1 : i32, i32, i32
  }
  func.func @transform_12(%arg0: i32) -> (i32, i32, i32) {
    %c0_i32 = arith.constant 0 : i32
    %c0_i32_0 = arith.constant 0 : i32
    %c0_i32_1 = arith.constant 0 : i32
    %c0_i32_2 = arith.constant 0 : i32
    return %c0_i32, %c0_i32_0, %c0_i32_1 : i32, i32, i32
  }
  func.func @transform_13(%arg0: i32) -> (i32, i32, i32) {
    %c0_i32 = arith.constant 0 : i32
    %c0_i32_0 = arith.constant 0 : i32
    %c0_i32_1 = arith.constant 0 : i32
    %c0_i32_2 = arith.constant 0 : i32
    return %c0_i32, %c0_i32_0, %c0_i32_1 : i32, i32, i32
  }
  func.func @transform_14(%arg0: i32) -> (i32, i32, i32) {
    %c0_i32 = arith.constant 0 : i32
    %c0_i32_0 = arith.constant 0 : i32
    %c0_i32_1 = arith.constant 0 : i32
    %c0_i32_2 = arith.constant 0 : i32
    return %c0_i32, %c0_i32_0, %c0_i32_1 : i32, i32, i32
  }
  func.func @transform_15(%arg0: i32) -> (i32, i32, i32) {
    %c0_i32 = arith.constant 0 : i32
    %c0_i32_0 = arith.constant 0 : i32
    %c0_i32_1 = arith.constant 0 : i32
    %c0_i32_2 = arith.constant 0 : i32
    return %c0_i32, %c0_i32_0, %c0_i32_1 : i32, i32, i32
  }
  func.func @transform_16(%arg0: i32) -> (i32, i32, i32) {
    %c0_i32 = arith.constant 0 : i32
    %c0_i32_0 = arith.constant 0 : i32
    %c0_i32_1 = arith.constant 0 : i32
    %c0_i32_2 = arith.constant 0 : i32
    return %c0_i32, %c0_i32_0, %c0_i32_1 : i32, i32, i32
  }
  func.func @transform_17(%arg0: i32) -> (i32, i32) {
    %c0_i32 = arith.constant 0 : i32
    %c0_i32_0 = arith.constant 0 : i32
    %c0_i32_1 = arith.constant 0 : i32
    return %c0_i32, %c0_i32_0 : i32, i32
  }
  func.func @transform_18(%arg0: i32) -> (i32, i32) {
    %c0_i32 = arith.constant 0 : i32
    %c0_i32_0 = arith.constant 0 : i32
    %c0_i32_1 = arith.constant 0 : i32
    return %c0_i32, %c0_i32_0 : i32, i32
  }
  func.func @transform_19(%arg0: i32) -> (i32, i32) {
    %c0_i32 = arith.constant 0 : i32
    %c0_i32_0 = arith.constant 0 : i32
    %c0_i32_1 = arith.constant 0 : i32
    return %c0_i32, %c0_i32_0 : i32, i32
  }
  func.func @transform_20(%arg0: i32) -> (i32, i32) {
    %c0_i32 = arith.constant 0 : i32
    %c0_i32_0 = arith.constant 0 : i32
    %c0_i32_1 = arith.constant 0 : i32
    return %c0_i32, %c0_i32_0 : i32, i32
  }
  func.func @transform_21(%arg0: i32) -> (i32, i32) {
    %c0_i32 = arith.constant 0 : i32
    %c0_i32_0 = arith.constant 0 : i32
    %c0_i32_1 = arith.constant 0 : i32
    return %c0_i32, %c0_i32_0 : i32, i32
  }
  func.func @transform_22(%arg0: i32) -> (i32, i32) {
    %c0_i32 = arith.constant 0 : i32
    %c0_i32_0 = arith.constant 0 : i32
    %c0_i32_1 = arith.constant 0 : i32
    return %c0_i32, %c0_i32_0 : i32, i32
  }
}

</mosaic_0001>

<bundles_post_ra>
// kernel: tpu_custom_call.1
= control target key start
LH: loop header
LB: loop body
LE: loop exit
PB: predicated region body
PF: predicated region fallthrough
CT: control target
= control target key end

     0   :  { %s4393_s0 = inlined_call_operand.hbm [shape: f32[16,64], index: 0, kind: input, shape index: {}]   ;;  %s4394_s1 = inlined_call_operand.vmem [shape: f32[2,8], index: 1, kind: input, shape index: {}]   ;;  %s4395_s2 = inlined_call_operand.vmem [shape: f32[2,1], index: 2, kind: input, shape index: {}]   ;;  %s4396_s3 = inlined_call_operand.hbm [shape: f32[1,64], index: 3, kind: input, shape index: {}]   ;;  %s4397_s4 = inlined_call_operand.hbm [shape: f32[1,64], index: 4, kind: input, shape index: {}]   ;;  %s4398_s5 = inlined_call_operand.vmem [shape: bf16[2,64,192], index: 5, kind: input, shape index: {}]   ;;  %s4399_s6 = inlined_call_operand.hbm [shape: f32[2,1,192], index: 6, kind: input, shape index: {}]   ;;  %s4400_s7 = inlined_call_operand.vmem [shape: bf16[2,64,64], index: 7, kind: input, shape index: {}]   ;;  %s4401_s8 = inlined_call_operand.hbm [shape: f32[2,1,64], index: 8, kind: input, shape index: {}]   ;;  %s4402_s9 = inlined_call_operand.hbm [shape: f32[2,1,64], index: 9, kind: input, shape index: {}]   ;;  %s4403_s10 = inlined_call_operand.hbm [shape: f32[2,1,64], index: 10, kind: input, shape index: {}]   ;;  %s4404_s11 = inlined_call_operand.hbm [shape: bf16[2,64,128], index: 11, kind: input, shape index: {}]   ;;  %s4405_s12 = inlined_call_operand.hbm [shape: f32[2,1,128], index: 12, kind: input, shape index: {}]   ;;  %s4406_s13 = inlined_call_operand.vmem [shape: bf16[2,128,64], index: 13, kind: input, shape index: {}]   ;;  %s4407_s14 = inlined_call_operand.hbm [shape: f32[2,1,64], index: 14, kind: input, shape index: {}]   ;;  %s4408_s15 = inlined_call_operand.hbm [shape: f32[2,1,64], index: 15, kind: input, shape index: {}]   ;;  %s4409_s16 = inlined_call_operand.hbm [shape: f32[2,1,64], index: 16, kind: input, shape index: {}]   ;;  %s4410_s17 = inlined_call_operand.vmem [shape: bf16[64,64], index: 17, kind: input, shape index: {}]   ;;  %s4411_s18 = inlined_call_operand.vmem [shape: f32[1,64], index: 18, kind: input, shape index: {}]   ;;  %s4412_s19 = inlined_call_operand.vmem [shape: f32[64,2], index: 19, kind: input, shape index: {}]   ;;  %s4413_s20 = inlined_call_operand.vmem [shape: f32[1,2], index: 20, kind: input, shape index: {}]   ;;  %s4414_s21 = inlined_call_operand.vmem [shape: f32[1,2], index: 21, kind: input, shape index: {}]   ;;  %s4415_s22 = inlined_call_operand.hbm [shape: f32[2,2], index: 22, kind: output, shape index: {}]  }
   0x1   :  { %4419 = sst [smem:[#allocation31_spill]] %s4393_s0 }
   0x2   :  { %4420 = sst [smem:[#allocation32_spill]] %s4394_s1 }
   0x3   :  { %4421 = sst [smem:[#allocation33_spill]] %s4395_s2 }
   0x4   :  { %4422 = sst [smem:[#allocation34_spill]] %s4396_s3 }
   0x5   :  { %4423 = sst [smem:[#allocation35_spill]] %s4397_s4 }
   0x6   :  { %4424 = sst [smem:[#allocation36_spill]] %s4398_s5 }
   0x7   :  { %4425 = sst [smem:[#allocation37_spill]] %s4399_s6 }
   0x8   :  { %27 = vsyncpa [#allocation3], 0 }
   0x9   :  { %28 = vsyncpa [#allocation6], 0 }
   0xa   :  { %29 = vsyncpa [#allocation9], 0 }
   0xb   :  { %30 = vsyncpa [#allocation12], 0 }
   0xc   :  { %31 = vsyncpa [#allocation15], 0 }
   0xd   :  { %32 = vsyncpa [#allocation18], 0 }
   0xe   :  { %33 = vsyncpa [#allocation21], 0 }
   0xf   :  { %34 = vsyncpa [#allocation4], 0  ;;  %s3749_s3 = smov [#allocation5]   ;;  %s3750_s29 = smov [#allocation8]  }
  0x10   :  { %s57_s28 = sshll.u32 %s3749_s3, 4  ;;  %s78_s30 = sshll.u32 %s3750_s29, 4  ;;  %s58_s28 = int_to_ptr.vmem [resolvable:$true] %s57_s28  ;;  %s79_s30 = int_to_ptr.vmem [resolvable:$true] %s78_s30 }
  0x11   :  { %s3481_s4 = scalar_lea.vmem %s58_s28, 16  ;;  %s3485_s0 = scalar_lea.vmem %s58_s28, 32 }
  0x12   :  { %p3482_p0 = scmp.ne.s32.totalorder %s58_s28, %s3481_s4  ;;  %p3486_p1 = scmp.lt.s32.totalorder %s58_s28, %s58_s28 }
  0x13   :  { %p3487_p2 = scmp.lt.s32.totalorder %s3485_s0, %s3481_s4 }
  0x15   :  { %p3488_p3 = por %p3487_p2, %p3486_p1 }
  0x17   :  { %p3489_p4 = pnand %p3488_p3, %p3482_p0 }
  0x19   :  { %3492 = shalt.err (!%p3489_p4)
}
  0x1a   :  { %s4426_s5 = sld [smem:[#allocation34_spill]]  ;;  %s3501_s24 = scalar_lea.vmem %s79_s30, 64 }
  0x1b   :  { %p3502_p5 = scmp.ne.s32.totalorder %s79_s30, %s3501_s24  ;;  %p3506_p6 = scmp.lt.s32.totalorder %s79_s30, %s79_s30 }
  0x1c   :  { %p3507_p7 = scmp.lt.s32.totalorder %s3501_s24, %s3501_s24 }
  0x1e   :  { %p3508_p8 = por %p3507_p7, %p3506_p6 }
  0x20   :  { %60 = dma.hbm_to_vmem [thread:$0]  %s4426_s5, 16, %s58_s28, [#allocation6]  }
  0x21   :  { %p3509_p9 = pnand %p3508_p8, %p3502_p5 }
  0x23   :  { %3512 = shalt.err (!%p3509_p9)
}
  0x24   :  { %s4417_s6 = smov 32   ;;  %s3752_s25 = smov 2  }
  0x25   :  { %s4427_s27 = sld [smem:[#allocation37_spill]]  ;;  %s3753_s3 = smov [#allocation11]  }
  0x26   :  { %s104_s29 = sshll.u32 %s3753_s3, 4  ;;  %s3754_s4 = smov [#allocation14]   ;;  %s105_s29 = int_to_ptr.vmem [resolvable:$true] %s104_s29 }
  0x27   :  { %s128_s0 = sshll.u32 %s3754_s4, 4  ;;  %s3521_s28 = scalar_lea.vmem %s105_s29, 32  ;;  %s129_s0 = int_to_ptr.vmem [resolvable:$true] %s128_s0 }
  0x28   :  { %p3522_p10 = scmp.ne.s32.totalorder %s105_s29, %s3521_s28  ;;  %p3526_p11 = scmp.lt.s32.totalorder %s105_s29, %s105_s29 }
  0x29   :  { %p3527_p12 = scmp.lt.s32.totalorder %s3521_s28, %s3521_s28 }
  0x2b   :  { %84 = dma.hbm_to_vmem [thread:$0]  %s4427_s27, 64, %s79_s30, [#allocation9], %s4417_s6, %s4417_s6, %s3752_s25  }
  0x2c   :  { %p3528_p13 = por %p3527_p12, %p3526_p11 }
  0x2e   :  { %p3529_p0 = pnand %p3528_p13, %p3522_p10 }
  0x30   :  { %3532 = shalt.err (!%p3529_p0)
}
  0x31   :  { %s3755_s23 = smov 16   ;;  %s3756_s1 = smov 1  }
  0x32   :  { %110 = dma.hbm_to_vmem [thread:$0]  %s4402_s9, 32, %s105_s29, [#allocation12], %s3755_s23, %s3755_s23, %s3756_s1  }
  0x33   :  { %s3541_s24 = scalar_lea.vmem %s129_s0, 1024  ;;  %p3546_p2 = scmp.lt.s32.totalorder %s129_s0, %s129_s0 }
  0x34   :  { %p3542_p1 = scmp.ne.s32.totalorder %s129_s0, %s3541_s24  ;;  %p3547_p3 = scmp.lt.s32.totalorder %s3541_s24, %s3541_s24 }
  0x36   :  { %p3548_p4 = por %p3547_p3, %p3546_p2 }
  0x38   :  { %p3549_p5 = pnand %p3548_p4, %p3542_p1 }
  0x3a   :  { %3552 = shalt.err (!%p3549_p5)
}
  0x3b   :  { %s3757_s25 = smov 64   ;;  %s3758_s26 = smov 4  }
  0x3c   :  { %134 = dma.hbm_to_vmem [thread:$0]  %s4404_s11, 1024, %s129_s0, [#allocation15], %s3757_s25, %s3757_s25, %s3758_s26  }
  0x3d   :  { %s3759_s3 = smov [#allocation17]   ;;  %s3760_s28 = smov [#allocation2]  }
  0x3e   :  { %s154_s4 = sshll.u32 %s3759_s3, 4  ;;  %s40_s5 = sshll.u32 %s3760_s28, 4  ;;  %s155_s4 = int_to_ptr.vmem [resolvable:$true] %s154_s4  ;;  %s41_s5 = int_to_ptr.vmem [resolvable:$true] %s40_s5 }
  0x3f   :  { %s3561_s9 = scalar_lea.vmem %s155_s4, 32  ;;  %p3566_p7 = scmp.lt.s32.totalorder %s155_s4, %s155_s4 }
  0x40   :  { %p3562_p6 = scmp.ne.s32.totalorder %s155_s4, %s3561_s9  ;;  %p3567_p8 = scmp.lt.s32.totalorder %s3561_s9, %s3561_s9 }
  0x42   :  { %p3568_p9 = por %p3567_p8, %p3566_p7 }
  0x44   :  { %p3569_p10 = pnand %p3568_p9, %p3562_p6 }
  0x46   :  { %3572 = shalt.err (!%p3569_p10)
}
  0x47   :  { %160 = dma.hbm_to_vmem [thread:$0]  %s4407_s14, 32, %s155_s4, [#allocation18], %s3755_s23, %s3755_s23, %s3756_s1  }
  0x48   :  { %s3581_s11 = scalar_lea.vmem %s41_s5, 256  ;;  %p3586_p12 = scmp.lt.s32.totalorder %s41_s5, %s41_s5 }
  0x49   :  { %p3582_p11 = scmp.ne.s32.totalorder %s41_s5, %s3581_s11  ;;  %p3587_p13 = scmp.lt.s32.totalorder %s3581_s11, %s3581_s11 }
  0x4b   :  { %p3588_p0 = por %p3587_p13, %p3586_p12 }
  0x4d   :  { %p3589_p1 = pnand %p3588_p0, %p3582_p11 }
  0x4f   :  { %3592 = shalt.err (!%p3589_p1)
}
  0x50   :  { %s3761_s0 = smov 128   ;;  %s3762_s24 = smov 8  }
  0x51   :  { %s4428_s27 = sld [smem:[#allocation31_spill]]  ;;  %s3763_s3 = smov [#allocation7]  }
  0x52   :  { %s67_s28 = sshll.u32 %s3763_s3, 4  ;;  %s3764_s9 = smov [#allocation10]   ;;  %s68_s28 = int_to_ptr.vmem [resolvable:$true] %s67_s28 }
  0x53   :  { %s92_s6 = sshll.u32 %s3764_s9, 4  ;;  %s3601_s14 = scalar_lea.vmem %s68_s28, 16  ;;  %s93_s6 = int_to_ptr.vmem [resolvable:$true] %s92_s6 }
  0x54   :  { %p3602_p2 = scmp.ne.s32.totalorder %s68_s28, %s3601_s14  ;;  %s3605_s4 = scalar_lea.vmem %s68_s28, 32 }
  0x55   :  { %p3606_p3 = scmp.lt.s32.totalorder %s68_s28, %s68_s28  ;;  %p3607_p4 = scmp.lt.s32.totalorder %s3605_s4, %s3601_s14 }
  0x57   :  { %46 = dma.hbm_to_vmem [thread:$0]  %s4428_s27, 256, %s41_s5, [#allocation3], %s3761_s0, %s3761_s0, %s3762_s24  }
  0x58   :  { %p3608_p5 = por %p3607_p4, %p3606_p3 }
  0x5a   :  { %p3609_p6 = pnand %p3608_p5, %p3602_p2 }
  0x5c   :  { %3612 = shalt.err (!%p3609_p6)
}
  0x5d   :  { %s4429_s11 = sld [smem:[#allocation35_spill]]  ;;  %s3621_s26 = scalar_lea.vmem %s93_s6, 32 }
  0x5e   :  { %p3622_p7 = scmp.ne.s32.totalorder %s93_s6, %s3621_s26  ;;  %p3626_p8 = scmp.lt.s32.totalorder %s93_s6, %s93_s6 }
  0x5f   :  { %p3627_p9 = scmp.lt.s32.totalorder %s3621_s26, %s3621_s26 }
  0x61   :  { %p3628_p10 = por %p3627_p9, %p3626_p8 }
  0x63   :  { %70 = dma.hbm_to_vmem [thread:$0]  %s4429_s11, 16, %s68_s28, [#allocation6]  }
  0x64   :  { %p3629_p11 = pnand %p3628_p10, %p3622_p7 }
  0x66   :  { %3632 = shalt.err (!%p3629_p11)
}
  0x67   :  { %98 = dma.hbm_to_vmem [thread:$0]  %s4401_s8, 32, %s93_s6, [#allocation9], %s3755_s23, %s3755_s23, %s3756_s1  }
  0x68   :  { %s3765_s24 = smov [#allocation13]   ;;  %s3766_s27 = smov [#allocation16]  }
  0x69   :  { %s116_s2 = sshll.u32 %s3765_s24, 4  ;;  %s140_s3 = sshll.u32 %s3766_s27, 4  ;;  %s117_s2 = int_to_ptr.vmem [resolvable:$true] %s116_s2  ;;  %s141_s3 = int_to_ptr.vmem [resolvable:$true] %s140_s3 }
  0x6a   :  { %s3641_s28 = scalar_lea.vmem %s117_s2, 32  ;;  %p3646_p13 = scmp.lt.s32.totalorder %s117_s2, %s117_s2 }
  0x6b   :  { %p3642_p12 = scmp.ne.s32.totalorder %s117_s2, %s3641_s28  ;;  %p3647_p0 = scmp.lt.s32.totalorder %s3641_s28, %s3641_s28 }
  0x6d   :  { %p3648_p1 = por %p3647_p0, %p3646_p13 }
  0x6f   :  { %p3649_p2 = pnand %p3648_p1, %p3642_p12 }
  0x71   :  { %3652 = shalt.err (!%p3649_p2)
}
  0x72   :  { %122 = dma.hbm_to_vmem [thread:$0]  %s4403_s10, 32, %s117_s2, [#allocation12], %s3755_s23, %s3755_s23, %s3756_s1  }
  0x73   :  { %s3661_s8 = scalar_lea.vmem %s141_s3, 32  ;;  %p3666_p4 = scmp.lt.s32.totalorder %s141_s3, %s141_s3 }
  0x74   :  { %p3662_p3 = scmp.ne.s32.totalorder %s141_s3, %s3661_s8  ;;  %p3667_p5 = scmp.lt.s32.totalorder %s3661_s8, %s3661_s8 }
  0x76   :  { %p3668_p6 = por %p3667_p5, %p3666_p4 }
  0x78   :  { %p3669_p7 = pnand %p3668_p6, %p3662_p3 }
  0x7a   :  { %3672 = shalt.err (!%p3669_p7)
}
  0x7b   :  { %146 = dma.hbm_to_vmem [thread:$0]  %s4405_s12, 32, %s141_s3, [#allocation15], %s3755_s23, %s3755_s23, %s3756_s1  }
  0x7c   :  { %s3767_s29 = smov [#allocation19]   ;;  %s3768_s11 = smov [#allocation20]  }
  0x7d   :  { %s166_s30 = sshll.u32 %s3767_s29, 4  ;;  %s178_s26 = sshll.u32 %s3768_s11, 4  ;;  %s167_s30 = int_to_ptr.vmem [resolvable:$true] %s166_s30  ;;  %s179_s26 = int_to_ptr.vmem [resolvable:$true] %s178_s26 }
  0x7e   :  { %s3681_s10 = scalar_lea.vmem %s167_s30, 32  ;;  %p3686_p9 = scmp.lt.s32.totalorder %s167_s30, %s167_s30 }
  0x7f   :  { %p3682_p8 = scmp.ne.s32.totalorder %s167_s30, %s3681_s10  ;;  %p3687_p10 = scmp.lt.s32.totalorder %s3681_s10, %s3681_s10 }
  0x81   :  { %p3688_p11 = por %p3687_p10, %p3686_p9 }
  0x83   :  { %p3689_p12 = pnand %p3688_p11, %p3682_p8 }
  0x85   :  { %3692 = shalt.err (!%p3689_p12)
}
  0x86   :  { %172 = dma.hbm_to_vmem [thread:$0]  %s4408_s15, 32, %s167_s30, [#allocation18], %s3755_s23, %s3755_s23, %s3756_s1  }
  0x87   :  { %s3701_s12 = scalar_lea.vmem %s179_s26, 32  ;;  %p3706_p0 = scmp.lt.s32.totalorder %s179_s26, %s179_s26 }
  0x88   :  { %p3702_p13 = scmp.ne.s32.totalorder %s179_s26, %s3701_s12  ;;  %p3707_p1 = scmp.lt.s32.totalorder %s3701_s12, %s3701_s12 }
  0x8a   :  { %p3708_p2 = por %p3707_p1, %p3706_p0 }
  0x8c   :  { %p3709_p3 = pnand %p3708_p2, %p3702_p13 }
  0x8e   :  { %3712 = shalt.err (!%p3709_p3)
}
  0x8f   :  { %184 = dma.hbm_to_vmem [thread:$0]  %s4409_s16, 32, %s179_s26, [#allocation21], %s3755_s23, %s3755_s23, %s3756_s1  }
  0x90   :  { %3733 = dma.done.wait [#allocation3], 256  }
  0x91   :  { %3734 = vsyncadd [#allocation3], 4294967040 }
  0x92   :  { %3735 = dma.done.wait [#allocation6], 32  }
  0x93   :  { %3736 = vsyncadd [#allocation6], 4294967264 }
  0x94   :  { %3737 = dma.done.wait [#allocation9], 96  }
  0x95   :  { %3738 = vsyncadd [#allocation9], 4294967200 }
  0x96   :  { %3739 = dma.done.wait [#allocation12], 64  }
  0x97   :  { %3740 = vsyncadd [#allocation12], 4294967232 }
  0x98   :  { %3741 = dma.done.wait [#allocation15], 1056  }
  0x99   :  { %3742 = vsyncadd [#allocation15], 4294966240 }
  0x9a   :  { %3743 = dma.done.wait [#allocation18], 64  }
  0x9b   :  { %3744 = vsyncadd [#allocation18], 4294967232 }
  0x9c   :  { %3745 = dma.done.wait [#allocation21], 32  }
  0x9d   :  { %3746 = vsyncadd [#allocation21], 4294967264  ;;  %vm278_vm0 = vcmask 523264   ;;  %v274_v0 = vld [vmem:[#allocation2] sm:$0xff]  ;;  %v275_v1 = vld [vmem:[#allocation2 + $0x8] sm:$0xff]  ;;  %s4430_s23 = sld [smem:[#allocation36_spill]]  ;;  %v245_v41 = vlaneseq }
  0x9e   :  { %v279_v2 = vsel %vm278_vm0, %v274_v0, 0.0  ;;  %v282_v3 = vsel %vm278_vm0, %v275_v1, 0.0  ;;  %v3769_v18 = vmov 0   ;;  %v2898_v31 = vld [vmem:[#allocation5] ss:$0 sm:$0xff]  ;;  %v3770_v40 = vmov 0.0  }
  0x9f   :  { %280 = vadd.xlane.f32.xlu0 %v279_v2  ;;  %418 = vmatprep.mubr.bf16.mxu0 %v3769_v18  ;;  %v2899_v35 = vld [vmem:[#allocation7] ss:$0 sm:$0xff]  ;;  %v3990_v42 = vshrl.u32 %v245_v41, 7  ;;  %v330_v44 = vld [vmem:[#allocation8] sm:$0x3]  ;;  %vm3771_vm1 = vmmov 0  }
  0xa0   :  { %3352 = vset.pattern.permute.xlu0 %v3769_v18  ;;  %3117 = vmatprep.subr.mxu1 %v3770_v40  ;;  %s3772_s5 = smov 96   ;;  %vm445_vm2 = vcmask 261120   ;;  %v3773_v62 = vmov 1966171168   ;;  %s4431_s24 = sld [smem:[#allocation32_spill]]  ;;  %vm756_vm3 = vcmask 64512  }
  0xa1   :  { %v3993_v43 = vsub.s32 0, %v3990_v42  ;;  %v339_v45 = vsub.s32 1, %v3990_v42  ;;  %3119 = vmatprep.mubr.msk.f32.mxu1 %vm3771_vm1, %v3770_v40  ;;  %v243_v63 = vunpack.c.l.s4 %v3773_v62  ;;  %s4432_s14 = smov 32   ;;  %vm2698_vm4 = vcmask 1041409  }
  0xa2   :  { %vm2872_vm5 = vcmask 9216  }
  0xa3   :  { %283 = vadd.xlane.f32.xlu0 %v282_v3  ;;  %v3353_v14 = vld [vmem:[%s4430_s23 + $0x34] ss:$8 sps:$4 sm:$0xff]   ;;  %v3355_v15 = vld [vmem:[%s4430_s23 + $0x30] ss:$8 sps:$4 sm:$0xff]   ;;  %v3356_v16 = vld [vmem:[%s4430_s23 + $0x24] ss:$8 sps:$4 sm:$0xff]   ;;  %v336_v46 = vrot.slane %v330_v44, %v3993_v43  ;;  %v340_v47 = vrot.slane %v330_v44, %v339_v45 }
  0xa4   :  { %394 = vmatprep.subr.bf16.mxu0 %v3353_v14  ;;  %v3358_v17 = vld [vmem:[%s4430_s23 + $0x20] ss:$8 sps:$4 sm:$0xff]   ;;  %v3359_v19 = vld [vmem:[%s4430_s23 + $0x14] ss:$8 sps:$4 sm:$0xff]   ;;  %v3361_v20 = vld [vmem:[%s4430_s23 + $0x10] ss:$8 sps:$4 sm:$0xff]  }
  0xa5   :  { %395 = vmatpush1.bf16.msra.mxu0 %v3355_v15  ;;  %v3362_v21 = vld [vmem:[%s4430_s23 + $0x4] ss:$8 sps:$4 sm:$0xff]   ;;  %v3364_v22 = vld [vmem:[%s4430_s23] ss:$8 sps:$4 sm:$0xff]  }
  0xa6   :  { %396 = vmatprep.subr.bf16.mxu0 %v3356_v16  ;;  %v2895_v2 = vld.sshfl [vmem:[%s4431_s24] sm:$0x11 pattern:$0x75316420] }
  0xa9   :  { %397 = vmatpush1.bf16.msra.mxu0 %v3358_v17 }
  0xaa   :  { %398 = vmatprep.subr.bf16.mxu0 %v3359_v19 }
  0xad   :  { %399 = vmatpush1.bf16.msra.mxu0 %v3361_v20 }
  0xae   :  { %400 = vmatprep.subr.bf16.mxu0 %v3362_v21 }
  0xb1   :  { %401 = vmatpush1.bf16.msra.mxu0 %v3364_v22 }
  0xb2   :  { %3142 = vmatprep.subr.mxu0 %v3770_v40 }
 0x128   :  { %v281_v4 = vpop.xlane.xlu0 %280 }
 0x129   :  { %v286_v5 = vmul.f32 0.015625, %v281_v4  ;;  %v241_v4 = vcombine.high %v2895_v2, %v2895_v2 }
 0x12b   :  { %v288_v6 = vsub.f32 %v274_v0, %v286_v5  ;;  %v244_v0 = vunpack.c.0.s8 %v243_v63 }
 0x12c   :  { %v284_v7 = vpop.xlane.xlu0 %283 }
 0x12d   :  { %v287_v8 = vmul.f32 0.015625, %v284_v7  ;;  %v290_v9 = vmul.f32 %v288_v6, %v288_v6 }
 0x12f   :  { %v289_v10 = vsub.f32 %v275_v1, %v287_v8  ;;  %v292_v11 = vsel %vm278_vm0, %v290_v9, 0.0  ;;  %v247_v1 = vsub.s32 %v244_v0, %v3990_v42 }
 0x130   :  { %293 = vadd.xlane.f32.xlu1 %v292_v11 }
 0x131   :  { %v291_v12 = vmul.f32 %v289_v10, %v289_v10  ;;  %v248_v3 = vrot.slane %v2895_v2, %v247_v1 }
 0x133   :  { %v295_v13 = vsel %vm278_vm0, %v291_v12, 0.0  ;;  %v2896_v5 = vadd.f32 -1.0, %v248_v3 }
 0x134   :  { %296 = vadd.xlane.f32.xlu1 %v295_v13 }
 0x135   :  { %v260_v7 = vmul.f32 1e+09, %v2896_v5 }
 0x137   :  { %v4042_v9 = vrot.slane %v260_v7, %v3993_v43 }
 0x1b9   :  { %v294_v23 = vpop.xlane.xlu1 %293 }
 0x1ba   :  { %v298_v24 = vmul.f32 0.015625, %v294_v23 }
 0x1bc   :  { %v300_v25 = vadd.f32 1e-12, %v298_v24 }
 0x1bd   :  { %v297_v26 = vpop.xlane.xlu1 %296 }
 0x1be   :  { %3413 = vrsqrt.f32 %v300_v25  ;;  %v299_v27 = vmul.f32 0.015625, %v297_v26 }
 0x1c0   :  { %v301_v28 = vadd.f32 1e-12, %v299_v27 }
 0x1c2   :  { %3415 = vrsqrt.f32 %v301_v28 }
 0x1cb   :  { %v3414_v29 = vpop.eup %3413 }
 0x1cc   :  { %v304_v30 = vmul.f32 %v3414_v29, %v288_v6  ;;  %v255_v6 = vrot.slane %v241_v4, %v247_v1 }
 0x1ce   :  { %v312_v34 = vmul.f32 %v2898_v31, %v304_v30  ;;  %v2897_v8 = vadd.f32 -1.0, %v255_v6 }
 0x1cf   :  { %v3416_v32 = vpop.eup %3415 }
 0x1d0   :  { %v305_v33 = vmul.f32 %v3416_v32, %v289_v10  ;;  %v3981_v37 = vadd.f32 %v2899_v35, %v312_v34  ;;  %v261_v10 = vmul.f32 1e+09, %v2897_v8 }
 0x1d2   :  { %v313_v36 = vmul.f32 %v2898_v31, %v305_v33  ;;  %v4046_v15 = vrot.slane %v261_v10, %v3993_v43  ;;  %v3365_v10 = vld [vmem:[%s4400_s7 + $0x18] sm:$0xff]  }
 0x1d4   :  { %v3983_v38 = vadd.f32 %v2899_v35, %v313_v36 }
 0x1d6   :  { %v331_v39 = vpack.c.bf16 %v3983_v38, %v3981_v37 }
 0x1d8   :  { %2908 = vmatmul.mubr.msk.bf16.vlgmr.msra.gmra.mxu0 %vm278_vm0, %v331_v39 }
 0x1d9   :  { %3144 = vmatprep.mubr.msk.f32.mxu0 %vm3771_vm1, %v3770_v40 }
 0x298   :  { %v420_v48 = vpop.f32.mrf.mxu0 }
 0x299   :  { %v421_v49 = vadd.f32 %v420_v48, %v336_v46 }
 0x29a   :  { %v422_v50 = vpop.f32.mrf.mxu0 }
 0x29b   :  { %v4003_v51 = vadd.f32 %v422_v50, %v340_v47  ;;  %431 = vrot.lane.b32.xlu0 %v421_v49, %s3772_s5 }
 0x29c   :  { %v424_v52 = vpop.f32.mrf.mxu0 }
 0x29d   :  { %v425_v53 = vadd.f32 %v424_v52, %v336_v46 }
 0x29e   :  { %v426_v54 = vpop.f32.mrf.mxu0 }
 0x29f   :  { %v4006_v55 = vadd.f32 %v426_v54, %v340_v47  ;;  %433 = vrot.lane.b32.xlu1 %v425_v53, %s3772_s5 }
 0x2a1   :  { %3143 = vmatpush3.msra.mxu0 %v4006_v55 }
 0x2a2   :  { %3152 = vmatprep.subr.mxu0 %v3770_v40 }
 0x2a3   :  { %443 = vrot.lane.b32.xlu1 %v421_v49, %s3757_s25 }
 0x2a7   :  { %520 = vrot.lane.b32.xlu1 %v425_v53, %s3757_s25 }
 0x30d   :  { %v432_v56 = vpop.permute.xlu0 %431 }
 0x30e   :  { %596 = vrot.lane.b32.xlu0 %v432_v56, %s3757_s25 }
 0x311   :  { %v434_v57 = vpop.permute.xlu1 %433 }
 0x312   :  { %672 = vrot.lane.b32.xlu1 %v434_v57, %s3757_s25 }
 0x315   :  { %v444_v58 = vpop.permute.xlu1 %443 }
 0x316   :  { %3118 = vmatpush3.xpose.msk.msra.mxu1 %vm445_vm2, %v444_v58 }
 0x317   :  { %3122 = vmatprep.subr.mxu1 %v3770_v40 }
 0x319   :  { %3120 = vmatmul.mubr.msk.f32.vlgmr.msra.gmra.mxu1 %vm445_vm2, %v421_v49  ;;  %v521_v59 = vpop.permute.xlu1 %520 }
 0x31a   :  { %3123 = vmatpush3.xpose.msk.msra.mxu1 %vm445_vm2, %v521_v59  ;;  %3124 = vmatprep.mubr.msk.f32.mxu1 %vm3771_vm1, %v3770_v40 }
 0x31b   :  { %3127 = vmatprep.subr.mxu1 %v3770_v40 }
 0x31d   :  { %3125 = vmatmul.mubr.msk.f32.vlgmr.msra.gmra.mxu1 %vm445_vm2, %v425_v53 }
 0x31e   :  { %3129 = vmatprep.mubr.msk.f32.mxu1 %vm3771_vm1, %v3770_v40 }
 0x380   :  { %v597_v60 = vpop.permute.xlu0 %596 }
 0x381   :  { %3128 = vmatpush3.xpose.msk.msra.mxu1 %vm445_vm2, %v597_v60 }
 0x382   :  { %3132 = vmatprep.subr.mxu1 %v3770_v40 }
 0x384   :  { %v673_v61 = vpop.permute.xlu1 %672  ;;  %3130 = vmatmul.mubr.msk.f32.vlgmr.msra.gmra.mxu1 %vm445_vm2, %v432_v56 }
 0x385   :  { %3133 = vmatpush3.xpose.msk.msra.mxu1 %vm445_vm2, %v673_v61  ;;  %3134 = vmatprep.mubr.msk.f32.mxu1 %vm3771_vm1, %v3770_v40 }
 0x386   :  { %3137 = vmatprep.subr.mxu1 %v3770_v40 }
 0x388   :  { %3135 = vmatmul.mubr.msk.f32.vlgmr.msra.gmra.mxu1 %vm445_vm2, %v434_v57 }
 0x389   :  { %3138 = vmatpush3.msra.mxu1 %v4003_v51  ;;  %3139 = vmatprep.mubr.msk.f32.mxu1 %vm3771_vm1, %v3770_v40 }
 0x38a   :  { %3147 = vmatprep.subr.mxu1 %v3770_v40 }
 0x3d9   :  { %v516_v11 = vpop.f32.mrf.mxu1 }
 0x3da   :  { %v748_v12 = vmul.f32 0.17677669, %v516_v11  ;;  %v3366_v11 = vld [vmem:[%s4400_s7 + $0x10] sm:$0xff]  }
 0x3db   :  { %v3121_v13 = vpop.f32.mrf.mxu1 }
 0x3dc   :  { %v752_v14 = vadd.f32 %v748_v12, %v4042_v9  ;;  %v3367_v12 = vld [vmem:[%s4400_s7 + $0x8] sm:$0xff]  }
 0x3dd   :  { %v592_v16 = vpop.f32.mrf.mxu1 }
 0x3de   :  { %v749_v17 = vmul.f32 0.17677669, %v592_v16  ;;  %v757_v19 = vsel %vm756_vm3, %v752_v14, -inf }
 0x3df   :  { %v3126_v20 = vpop.f32.mrf.mxu1  ;;  %758 = vmax.xlane.f32.xlu0 %v757_v19  ;;  %v3368_v19 = vld [vmem:[%s4400_s7] sm:$0xff]  }
 0x3e0   :  { %v753_v21 = vadd.f32 %v749_v17, %v4046_v15 }
 0x3e2   :  { %v760_v22 = vsel %vm756_vm3, %v753_v21, -inf }
 0x3e3   :  { %761 = vmax.xlane.f32.xlu1 %v760_v22 }
 0x444   :  { %v668_v23 = vpop.f32.mrf.mxu1 }
 0x445   :  { %v750_v24 = vmul.f32 0.17677669, %v668_v23 }
 0x446   :  { %v3131_v25 = vpop.f32.mrf.mxu1 }
 0x447   :  { %v754_v26 = vadd.f32 %v750_v24, %v4042_v9 }
 0x448   :  { %v744_v27 = vpop.f32.mrf.mxu1 }
 0x449   :  { %v751_v28 = vmul.f32 0.17677669, %v744_v27  ;;  %v763_v29 = vsel %vm756_vm3, %v754_v26, -inf }
 0x44a   :  { %v3136_v30 = vpop.f32.mrf.mxu1  ;;  %764 = vmax.xlane.f32.xlu0 %v763_v29 }
 0x44b   :  { %v755_v31 = vadd.f32 %v751_v28, %v4046_v15 }
 0x44d   :  { %v766_v32 = vsel %vm756_vm3, %v755_v31, -inf }
 0x44e   :  { %767 = vmax.xlane.f32.xlu0 %v766_v32 }
 0x468   :  { %v759_v33 = vpop.xlane.xlu0 %758 }
 0x469   :  { %v769_v34 = vsub.f32 %v752_v14, %v759_v33 }
 0x46b   :  { %v773_v35 = vmul.f32 1.442695, %v769_v34 }
 0x46c   :  { %v762_v36 = vpop.xlane.xlu1 %761 }
 0x46d   :  { %3417 = vpow2.f32 %v773_v35  ;;  %v770_v39 = vsub.f32 %v753_v21, %v762_v36 }
 0x46f   :  { %v775_v41 = vmul.f32 1.442695, %v770_v39 }
 0x471   :  { %3419 = vpow2.f32 %v775_v41 }
 0x47a   :  { %v3418_v44 = vpop.eup %3417 }
 0x47b   :  { %v781_v46 = vsel %vm756_vm3, %v3418_v44, 0.0 }
 0x47c   :  { %782 = vadd.xlane.f32.xlu0 %v781_v46 }
 0x47e   :  { %v3420_v47 = vpop.eup %3419 }
 0x47f   :  { %v784_v48 = vsel %vm756_vm3, %v3420_v47, 0.0 }
 0x480   :  { %785 = vadd.xlane.f32.xlu1 %v784_v48 }
 0x4d3   :  { %v765_v49 = vpop.xlane.xlu0 %764 }
 0x4d4   :  { %v771_v50 = vsub.f32 %v754_v26, %v765_v49 }
 0x4d6   :  { %v777_v52 = vmul.f32 1.442695, %v771_v50 }
 0x4d7   :  { %v768_v53 = vpop.xlane.xlu0 %767 }
 0x4d8   :  { %3421 = vpow2.f32 %v777_v52  ;;  %v772_v54 = vsub.f32 %v755_v31, %v768_v53  ;;  %v2921_v31 = vld [vmem:[#allocation10] ss:$0 sm:$0xff] }
 0x4da   :  { %v779_v56 = vmul.f32 1.442695, %v772_v54 }
 0x4dc   :  { %3423 = vpow2.f32 %v779_v56 }
 0x4e5   :  { %v3422_v57 = vpop.eup %3421 }
 0x4e6   :  { %v787_v58 = vsel %vm756_vm3, %v3422_v57, 0.0 }
 0x4e7   :  { %788 = vadd.xlane.f32.xlu0 %v787_v58 }
 0x4e9   :  { %v3424_v59 = vpop.eup %3423 }
 0x4ea   :  { %v790_v60 = vsel %vm756_vm3, %v3424_v59, 0.0 }
 0x4eb   :  { %791 = vadd.xlane.f32.xlu1 %v790_v60  ;;  %v3371_v60 = vld [vmem:[#allocation14 + $0x8] sm:$0xff]  }
 0x4fc   :  { %439 = vrot.lane.b32.xlu1 %v4006_v55, %s3772_s5 }
 0x4fd   :  { %437 = vrot.lane.b32.xlu0 %v4003_v51, %s3772_s5 }
 0x505   :  { %v783_v61 = vpop.xlane.xlu0 %782 }
 0x506   :  { %3425 = vrcp.f32 %v783_v61  ;;  %v3372_v61 = vld [vmem:[#allocation14] sm:$0xff]  }
 0x509   :  { %v786_v62 = vpop.xlane.xlu1 %785 }
 0x50a   :  { %3427 = vrcp.f32 %v786_v62 }
 0x513   :  { %v3426_v63 = vpop.eup %3425 }
 0x514   :  { %v797_v0 = vmul.f32 %v3426_v63, %v3418_v44 }
 0x516   :  { %3140 = vmatmul.mubr.msk.f32.vlgmr.msra.gmra.mxu1 %vm756_vm3, %v797_v0 }
 0x517   :  { %v3428_v1 = vpop.eup %3427  ;;  %3149 = vmatprep.mubr.msk.f32.mxu1 %vm3771_vm1, %v3770_v40 }
 0x518   :  { %v798_v2 = vmul.f32 %v3428_v1, %v3420_v47 }
 0x51a   :  { %3145 = vmatmul.mubr.msk.f32.vlgmr.msra.gmra.mxu0 %vm756_vm3, %v798_v2 }
 0x51b   :  { %3154 = vmatprep.mubr.msk.f32.mxu0 %vm3771_vm1, %v3770_v40 }
 0x570   :  { %v789_v55 = vpop.xlane.xlu0 %788 }
 0x571   :  { %3429 = vrcp.f32 %v789_v55 }
 0x574   :  { %v438_v51 = vpop.permute.xlu0 %437  ;;  %v792_v3 = vpop.xlane.xlu1 %791 }
 0x575   :  { %3431 = vrcp.f32 %v792_v3  ;;  %3148 = vmatpush3.msra.mxu1 %v438_v51 }
 0x576   :  { %3157 = vmatprep.subr.bf16.mxu1 %v3770_v40 }
 0x578   :  { %v440_v4 = vpop.permute.xlu1 %439 }
 0x579   :  { %3153 = vmatpush3.msra.mxu0 %v440_v4  ;;  %v2927_v4 = vld [vmem:[#allocation11] ss:$0 sm:$0xff] }
 0x57a   :  { %3169 = vmatprep.subr.bf16.mxu0 %v3770_v40 }
 0x57e   :  { %v3430_v5 = vpop.eup %3429 }
 0x57f   :  { %v799_v6 = vmul.f32 %v3430_v5, %v3422_v57 }
 0x581   :  { %3150 = vmatmul.mubr.msk.f32.vlgmr.msra.gmra.mxu1 %vm756_vm3, %v799_v6 }
 0x582   :  { %v3432_v7 = vpop.eup %3431  ;;  %3165 = vmatprep.mubr.msk.bf16.mxu1 %vm3771_vm1, %v3770_v40  ;;  %3158 = vmatpush3.bf16.msra.mxu1 %v3365_v10 }
 0x583   :  { %v800_v8 = vmul.f32 %v3432_v7, %v3424_v59  ;;  %3159 = vmatprep.subr.bf16.mxu1 %v3770_v40  ;;  %v3369_v59 = vld [vmem:[#allocation14 + $0x18] sm:$0xff]  }
 0x585   :  { %3155 = vmatmul.mubr.msk.f32.vlgmr.msra.gmra.mxu0 %vm756_vm3, %v800_v8  ;;  %v2928_v8 = vld [vmem:[#allocation13] ss:$0 sm:$0xff] }
 0x586   :  { %3177 = vmatprep.mubr.msk.bf16.mxu0 %vm3771_vm1, %v3770_v40  ;;  %3160 = vmatpush3.bf16.msra.mxu1 %v3366_v11 }
 0x587   :  { %3161 = vmatprep.subr.bf16.mxu1 %v3770_v40  ;;  %3170 = vmatpush3.bf16.msra.mxu0 %v3369_v59 }
 0x588   :  { %3171 = vmatprep.subr.bf16.mxu0 %v3770_v40 }
 0x58a   :  { %3162 = vmatpush3.bf16.msra.mxu1 %v3367_v12 }
 0x58b   :  { %3163 = vmatprep.subr.bf16.mxu1 %v3770_v40 }
 0x58e   :  { %3164 = vmatpush3.bf16.msra.mxu1 %v3368_v19  ;;  %v3377_v19 = vld [vmem:[%s4406_s13 + $0x18] sm:$0xff]  }
 0x58f   :  { %3181 = vmatprep.subr.bf16.mxu1 %v3770_v40 }
 0x5d6   :  { %v870_v13 = vpop.f32.mrf.mxu1 }
 0x5d8   :  { %v3141_v14 = vpop.f32.mrf.mxu1 }
 0x5d9   :  { %v3373_v14 = vld [vmem:[%s4406_s13 + $0x38] sm:$0xff]  }
 0x5da   :  { %v943_v16 = vpop.f32.mrf.mxu0 }
 0x5dc   :  { %v3146_v17 = vpop.f32.mrf.mxu0 }
 0x5dd   :  { %v3375_v17 = vld [vmem:[%s4406_s13 + $0x28] sm:$0xff]  }
 0x641   :  { %v1016_v20 = vpop.f32.mrf.mxu1 }
 0x643   :  { %v3151_v21 = vpop.f32.mrf.mxu1 }
 0x644   :  { %v3379_v21 = vld [vmem:[%s4406_s13 + $0x8] sm:$0xff]  }
 0x645   :  { %v1089_v22 = vpop.f32.mrf.mxu0 }
 0x646   :  { %v3342_v23 = vpack.i.bf16 %v1089_v22, %v1016_v20  ;;  %v3378_v20 = vld [vmem:[%s4406_s13 + $0x10] sm:$0xff]   ;;  %v3380_v22 = vld [vmem:[%s4406_s13] sm:$0xff]  }
 0x647   :  { %v3156_v24 = vpop.f32.mrf.mxu0 }
 0x648   :  { %3343 = vrot.lane.b32.xlu1 %v3342_v23, %s4432_s14  ;;  %v2929_v23 = vld [vmem:[#allocation16] ss:$0 sm:$0xff] }
 0x6ba   :  { %v3344_v25 = vpop.permute.xlu1 %3343 }
 0x6bb   :  { %v3346_v26 = vunpack.i.h.bf16 %v3344_v25  ;;  %v3345_v27 = vunpack.i.l.bf16 %v3344_v25 }
 0x6bd   :  { %v1102_v28 = vsel %vm445_vm2, %v943_v16, %v3346_v26  ;;  %v1101_v29 = vsel %vm445_vm2, %v870_v13, %v3345_v27  ;;  %v3374_v16 = vld [vmem:[%s4406_s13 + $0x30] sm:$0xff]  }
 0x6be   :  { %v1112_v30 = vpack.c.bf16 %v1102_v28, %v1101_v29 }
 0x6c0   :  { %3166 = vmatmul.mubr.msk.bf16.vlgmr.msra.gmra.mxu1 %vm278_vm0, %v1112_v30 }
 0x6c1   :  { %3197 = vmatprep.mubr.msk.bf16.mxu1 %vm3771_vm1, %v3770_v40  ;;  %3182 = vmatpush3.bf16.msra.mxu1 %v3373_v14  ;;  %v3384_v14 = vld [vmem:[%s4430_s23 + $0x60] ss:$8 sps:$4 sm:$0xff]  }
 0x6c2   :  { %3183 = vmatprep.subr.bf16.mxu1 %v3770_v40 }
 0x6c5   :  { %3184 = vmatpush3.bf16.msra.mxu1 %v3374_v16  ;;  %v3389_v16 = vld [vmem:[%s4430_s23 + $0x54] ss:$8 sps:$4 sm:$0xff]  }
 0x6c6   :  { %3185 = vmatprep.subr.bf16.mxu1 %v3770_v40 }
 0x6c9   :  { %3186 = vmatpush3.bf16.msra.mxu1 %v3375_v17  ;;  %v3387_v17 = vld [vmem:[%s4430_s23 + $0x50] ss:$8 sps:$4 sm:$0xff]  }
 0x6ca   :  { %3187 = vmatprep.subr.bf16.mxu1 %v3770_v40 }
 0x780   :  { %v1180_v32 = vpop.f32.mrf.mxu1 }
 0x781   :  { %v1181_v33 = vadd.f32 %v2921_v31, %v1180_v32 }
 0x782   :  { %v3167_v34 = vpop.f32.mrf.mxu1 }
 0x783   :  { %v1187_v35 = vadd.f32 %v1181_v33, %v3981_v37 }
 0x784   :  { %v1183_v36 = vpop.f32.mrf.mxu1 }
 0x785   :  { %v1184_v39 = vadd.f32 %v2921_v31, %v1183_v36  ;;  %v1191_v41 = vsel %vm278_vm0, %v1187_v35, 0.0 }
 0x786   :  { %1192 = vadd.xlane.f32.xlu1 %v1191_v41  ;;  %v3168_v44 = vpop.f32.mrf.mxu1 }
 0x787   :  { %v1188_v46 = vadd.f32 %v1184_v39, %v3983_v38  ;;  %v3370_v38 = vld [vmem:[#allocation14 + $0x10] sm:$0xff]  }
 0x788   :  { %3172 = vmatpush3.bf16.msra.mxu0 %v3370_v38 }
 0x789   :  { %v1194_v47 = vsel %vm278_vm0, %v1188_v46, 0.0  ;;  %3173 = vmatprep.subr.bf16.mxu0 %v3770_v40 }
 0x78a   :  { %1195 = vadd.xlane.f32.xlu0 %v1194_v47 }
 0x78c   :  { %3174 = vmatpush3.bf16.msra.mxu0 %v3371_v60 }
 0x78d   :  { %3175 = vmatprep.subr.bf16.mxu0 %v3770_v40 }
 0x790   :  { %3176 = vmatpush3.bf16.msra.mxu0 %v3372_v61 }
 0x80f   :  { %v1193_v48 = vpop.xlane.xlu1 %1192 }
 0x810   :  { %v1197_v49 = vmul.f32 0.015625, %v1193_v48 }
 0x812   :  { %v1199_v50 = vsub.f32 %v1187_v35, %v1197_v49 }
 0x813   :  { %v1196_v52 = vpop.xlane.xlu0 %1195 }
 0x814   :  { %v1198_v53 = vmul.f32 0.015625, %v1196_v52  ;;  %v1201_v54 = vmul.f32 %v1199_v50, %v1199_v50 }
 0x816   :  { %v1200_v56 = vsub.f32 %v1188_v46, %v1198_v53  ;;  %v1203_v37 = vsel %vm278_vm0, %v1201_v54, 0.0 }
 0x817   :  { %1204 = vadd.xlane.f32.xlu0 %v1203_v37  ;;  %v2935_v37 = vld [vmem:[#allocation17] ss:$0 sm:$0xff] }
 0x818   :  { %v1202_v57 = vmul.f32 %v1200_v56, %v1200_v56 }
 0x81a   :  { %v1206_v58 = vsel %vm278_vm0, %v1202_v57, 0.0 }
 0x81b   :  { %1207 = vadd.xlane.f32.xlu0 %v1206_v58 }
 0x8a0   :  { %v1205_v62 = vpop.xlane.xlu0 %1204 }
 0x8a1   :  { %v1209_v63 = vmul.f32 0.015625, %v1205_v62 }
 0x8a3   :  { %v1211_v0 = vadd.f32 1e-12, %v1209_v63 }
 0x8a4   :  { %v1208_v1 = vpop.xlane.xlu0 %1207 }
 0x8a5   :  { %3433 = vrsqrt.f32 %v1211_v0  ;;  %v1210_v2 = vmul.f32 0.015625, %v1208_v1 }
 0x8a7   :  { %v1212_v55 = vadd.f32 1e-12, %v1210_v2 }
 0x8a9   :  { %3435 = vrsqrt.f32 %v1212_v55 }
 0x8b2   :  { %v3434_v51 = vpop.eup %3433 }
 0x8b3   :  { %v1215_v3 = vmul.f32 %v3434_v51, %v1199_v50 }
 0x8b5   :  { %v1223_v7 = vmul.f32 %v2927_v4, %v1215_v3 }
 0x8b6   :  { %v3436_v5 = vpop.eup %3435 }
 0x8b7   :  { %v1216_v6 = vmul.f32 %v3436_v5, %v1200_v56  ;;  %v4108_v11 = vadd.f32 %v2928_v8, %v1223_v7 }
 0x8b9   :  { %v1224_v10 = vmul.f32 %v2927_v4, %v1216_v6 }
 0x8bb   :  { %v4110_v12 = vadd.f32 %v2928_v8, %v1224_v10 }
 0x8bd   :  { %v1242_v13 = vpack.c.bf16 %v4110_v12, %v4108_v11 }
 0x8bf   :  { %3178 = vmatmul.mubr.msk.bf16.vlgmr.msra.gmra.mxu0 %vm278_vm0, %v1242_v13  ;;  %v3386_v13 = vld [vmem:[%s4430_s23 + $0x64] ss:$8 sps:$4 sm:$0xff]  }
 0x8c0   :  { %1592 = vmatprep.mubr.bf16.mxu0 %v3769_v18  ;;  %v3376_v18 = vld [vmem:[%s4406_s13 + $0x20] sm:$0xff]  }
 0x8c1   :  { %3188 = vmatpush3.bf16.msra.mxu1 %v3376_v18  ;;  %v3392_v18 = vld [vmem:[%s4430_s23 + $0x44] ss:$8 sps:$4 sm:$0xff]  }
 0x8c2   :  { %3189 = vmatprep.subr.bf16.mxu1 %v3770_v40 }
 0x8c5   :  { %3190 = vmatpush3.bf16.msra.mxu1 %v3377_v19  ;;  %v3390_v19 = vld [vmem:[%s4430_s23 + $0x40] ss:$8 sps:$4 sm:$0xff]  }
 0x8c6   :  { %3191 = vmatprep.subr.bf16.mxu1 %v3770_v40 }
 0x8c9   :  { %3192 = vmatpush3.bf16.msra.mxu1 %v3378_v20 }
 0x8ca   :  { %3193 = vmatprep.subr.bf16.mxu1 %v3770_v40 }
 0x8cd   :  { %3194 = vmatpush3.bf16.msra.mxu1 %v3379_v21 }
 0x8ce   :  { %3195 = vmatprep.subr.bf16.mxu1 %v3770_v40 }
 0x8d1   :  { %3196 = vmatpush3.bf16.msra.mxu1 %v3380_v22 }
 0x8d2   :  { %3221 = vmatprep.subr.mxu1 %v3770_v40 }
 0x97f   :  { %v1310_v24 = vpop.f32.mrf.mxu0 }
 0x980   :  { %v1311_v25 = vadd.f32 %v2929_v23, %v1310_v24 }
 0x981   :  { %v3179_v26 = vpop.f32.mrf.mxu0 }
 0x982   :  { %v1317_v27 = vmul.f32 %v1311_v25, %v1311_v25 }
 0x983   :  { %v1313_v28 = vpop.f32.mrf.mxu0 }
 0x984   :  { %v1319_v29 = vmul.f32 %v1317_v27, %v1311_v25  ;;  %v1314_v30 = vadd.f32 %v2929_v23, %v1313_v28  ;;  %v2944_v28 = vld [vmem:[#allocation19] ss:$0 sm:$0xff] }
 0x985   :  { %v3180_v31 = vpop.f32.mrf.mxu0 }
 0x986   :  { %v1321_v32 = vmul.f32 0.044715, %v1319_v29  ;;  %v1318_v33 = vmul.f32 %v1314_v30, %v1314_v30 }
 0x988   :  { %v1323_v34 = vadd.f32 %v1321_v32, %v1311_v25  ;;  %v1320_v35 = vmul.f32 %v1318_v33, %v1314_v30  ;;  %v2945_v32 = vld [vmem:[#allocation20] ss:$0 sm:$0xff] }
 0x98a   :  { %v1325_v36 = vmul.f32 0.7978846, %v1323_v34  ;;  %v1322_v39 = vmul.f32 0.044715, %v1320_v35 }
 0x98c   :  { %3437 = vtanh.f32 %v1325_v36  ;;  %v1324_v41 = vadd.f32 %v1322_v39, %v1314_v30  ;;  %v1504_v39 = vld [vmem:[#allocation8 + $0x2] sm:$0x3] }
 0x98e   :  { %v1326_v44 = vmul.f32 0.7978846, %v1324_v41  ;;  %v1510_v41 = vrot.slane %v1504_v39, %v3993_v43 }
 0x990   :  { %3439 = vtanh.f32 %v1326_v44  ;;  %v1514_v44 = vrot.slane %v1504_v39, %v339_v45 }
 0x999   :  { %v3438_v46 = vpop.eup %3437 }
 0x99a   :  { %v1329_v47 = vadd.f32 1.0, %v3438_v46 }
 0x99c   :  { %v1331_v49 = vmul.f32 0.5, %v1329_v47 }
 0x99d   :  { %v3440_v48 = vpop.eup %3439 }
 0x99e   :  { %v1330_v50 = vadd.f32 1.0, %v3440_v48  ;;  %v1333_v53 = vmul.f32 %v1331_v49, %v1311_v25 }
 0x9a0   :  { %v1332_v52 = vmul.f32 0.5, %v1330_v50 }
 0x9a2   :  { %v1334_v54 = vmul.f32 %v1332_v52, %v1314_v30 }
 0x9a4   :  { %v1352_v56 = vpack.c.bf16 %v1334_v54, %v1333_v53 }
 0x9a6   :  { %3198 = vmatmul.mubr.bf16.vlgmr.msra.gmra.mxu1 %v1352_v56 }
 0x9a7   :  { %3223 = vmatprep.mubr.msk.f32.mxu1 %vm3771_vm1, %v3770_v40 }
 0xa66   :  { %v1441_v57 = vpop.f32.mrf.mxu1 }
 0xa67   :  { %v1442_v58 = vadd.f32 %v2935_v37, %v1441_v57 }
 0xa68   :  { %v3199_v59 = vpop.f32.mrf.mxu1 }
 0xa69   :  { %v1448_v38 = vadd.f32 %v1442_v58, %v4108_v11  ;;  %v3383_v11 = vld [vmem:[%s4430_s23 + $0x74] ss:$8 sps:$4 sm:$0xff]  }
 0xa6a   :  { %v1444_v60 = vpop.f32.mrf.mxu1  ;;  %1568 = vmatprep.subr.bf16.mxu0 %v3383_v11 }
 0xa6b   :  { %v1445_v61 = vadd.f32 %v2935_v37, %v1444_v60  ;;  %v1452_v62 = vsel %vm278_vm0, %v1448_v38, 0.0 }
 0xa6c   :  { %1453 = vadd.xlane.f32.xlu1 %v1452_v62  ;;  %v3200_v63 = vpop.f32.mrf.mxu1 }
 0xa6d   :  { %v1449_v0 = vadd.f32 %v1445_v61, %v4110_v12  ;;  %v3381_v12 = vld [vmem:[%s4430_s23 + $0x70] ss:$8 sps:$4 sm:$0xff]  }
 0xa6e   :  { %1569 = vmatpush1.bf16.msra.mxu0 %v3381_v12 }
 0xa6f   :  { %v1455_v1 = vsel %vm278_vm0, %v1449_v0, 0.0  ;;  %1570 = vmatprep.subr.bf16.mxu0 %v3386_v13 }
 0xa70   :  { %1456 = vadd.xlane.f32.xlu0 %v1455_v1 }
 0xa72   :  { %1571 = vmatpush1.bf16.msra.mxu0 %v3384_v14 }
 0xa73   :  { %1572 = vmatprep.subr.bf16.mxu0 %v3389_v16 }
 0xa76   :  { %1573 = vmatpush1.bf16.msra.mxu0 %v3387_v17 }
 0xa77   :  { %1574 = vmatprep.subr.bf16.mxu0 %v3392_v18 }
 0xa7a   :  { %1575 = vmatpush1.bf16.msra.mxu0 %v3390_v19 }
 0xa7b   :  { %3201 = vmatprep.subr.mxu0 %v3770_v40 }
 0xaf5   :  { %v1454_v2 = vpop.xlane.xlu1 %1453 }
 0xaf6   :  { %v1458_v55 = vmul.f32 0.015625, %v1454_v2 }
 0xaf8   :  { %v1460_v51 = vsub.f32 %v1448_v38, %v1458_v55 }
 0xaf9   :  { %v1457_v3 = vpop.xlane.xlu0 %1456 }
 0xafa   :  { %v1459_v4 = vmul.f32 0.015625, %v1457_v3  ;;  %v1462_v5 = vmul.f32 %v1460_v51, %v1460_v51 }
 0xafc   :  { %v1461_v6 = vsub.f32 %v1449_v0, %v1459_v4  ;;  %v1464_v7 = vsel %vm278_vm0, %v1462_v5, 0.0 }
 0xafd   :  { %1465 = vadd.xlane.f32.xlu1 %v1464_v7 }
 0xafe   :  { %v1463_v8 = vmul.f32 %v1461_v6, %v1461_v6 }
 0xb00   :  { %v1467_v10 = vsel %vm278_vm0, %v1463_v8, 0.0 }
 0xb01   :  { %1468 = vadd.xlane.f32.xlu0 %v1467_v10 }
 0xb86   :  { %v1466_v20 = vpop.xlane.xlu1 %1465 }
 0xb87   :  { %v1470_v21 = vmul.f32 0.015625, %v1466_v20 }
 0xb89   :  { %v1472_v22 = vadd.f32 1e-12, %v1470_v21 }
 0xb8a   :  { %v1469_v23 = vpop.xlane.xlu0 %1468 }
 0xb8b   :  { %3441 = vrsqrt.f32 %v1472_v22  ;;  %v1471_v24 = vmul.f32 0.015625, %v1469_v23 }
 0xb8d   :  { %v1473_v25 = vadd.f32 1e-12, %v1471_v24 }
 0xb8f   :  { %3443 = vrsqrt.f32 %v1473_v25 }
 0xb98   :  { %v3442_v26 = vpop.eup %3441 }
 0xb99   :  { %v1476_v27 = vmul.f32 %v3442_v26, %v1460_v51 }
 0xb9b   :  { %v1484_v31 = vmul.f32 %v2944_v28, %v1476_v27 }
 0xb9c   :  { %v3444_v29 = vpop.eup %3443 }
 0xb9d   :  { %v1477_v30 = vmul.f32 %v3444_v29, %v1461_v6  ;;  %v4181_v34 = vadd.f32 %v2945_v32, %v1484_v31 }
 0xb9f   :  { %v1485_v33 = vmul.f32 %v2944_v28, %v1477_v30 }
 0xba1   :  { %v4183_v35 = vadd.f32 %v2945_v32, %v1485_v33 }
 0xba3   :  { %v1505_v36 = vpack.c.bf16 %v4183_v35, %v4181_v34 }
 0xba5   :  { %2962 = vmatmul.mubr.msk.bf16.vlgmr.msra.gmra.mxu0 %vm278_vm0, %v1505_v36 }
 0xba6   :  { %3203 = vmatprep.mubr.msk.f32.mxu0 %vm3771_vm1, %v3770_v40 }
 0xc65   :  { %v1594_v46 = vpop.f32.mrf.mxu0 }
 0xc66   :  { %v1595_v47 = vadd.f32 %v1594_v46, %v1510_v41 }
 0xc67   :  { %v1596_v48 = vpop.f32.mrf.mxu0 }
 0xc68   :  { %v4193_v49 = vadd.f32 %v1596_v48, %v1514_v44  ;;  %1605 = vrot.lane.b32.xlu1 %v1595_v47, %s3772_s5 }
 0xc69   :  { %v1598_v50 = vpop.f32.mrf.mxu0 }
 0xc6a   :  { %v1599_v52 = vadd.f32 %v1598_v50, %v1510_v41  ;;  %3222 = vmatpush3.msra.mxu1 %v4193_v49 }
 0xc6b   :  { %3231 = vmatprep.subr.mxu1 %v3770_v40  ;;  %v1600_v56 = vpop.f32.mrf.mxu0 }
 0xc6c   :  { %1607 = vrot.lane.b32.xlu0 %v1599_v52, %s3772_s5  ;;  %1617 = vrot.lane.b32.xlu1 %v1595_v47, %s3757_s25  ;;  %v1601_v57 = vadd.f32 %v1600_v56, %v1514_v44 }
 0xc70   :  { %1693 = vrot.lane.b32.xlu1 %v1599_v52, %s3757_s25 }
 0xcda   :  { %v1606_v42 = vpop.permute.xlu1 %1605 }
 0xcdb   :  { %1769 = vrot.lane.b32.xlu1 %v1606_v42, %s3757_s25 }
 0xcde   :  { %v1608_v43 = vpop.permute.xlu0 %1607  ;;  %v1618_v45 = vpop.permute.xlu1 %1617 }
 0xcdf   :  { %1845 = vrot.lane.b32.xlu0 %v1608_v43, %s3757_s25  ;;  %3202 = vmatpush3.xpose.msk.msra.mxu0 %vm445_vm2, %v1618_v45  ;;  %v3394_v45 = vld [vmem:[%s4400_s7 + $0x30] sm:$0xff]  }
 0xce0   :  { %3206 = vmatprep.subr.mxu0 %v3770_v40 }
 0xce2   :  { %3204 = vmatmul.mubr.msk.f32.vlgmr.msra.gmra.mxu0 %vm445_vm2, %v1595_v47  ;;  %v1694_v53 = vpop.permute.xlu1 %1693 }
 0xce3   :  { %3207 = vmatpush3.xpose.msk.msra.mxu0 %vm445_vm2, %v1694_v53  ;;  %3208 = vmatprep.mubr.msk.f32.mxu0 %vm3771_vm1, %v3770_v40  ;;  %v3395_v53 = vld [vmem:[%s4400_s7 + $0x28] sm:$0xff]  }
 0xce4   :  { %3211 = vmatprep.subr.mxu0 %v3770_v40 }
 0xce6   :  { %3209 = vmatmul.mubr.msk.f32.vlgmr.msra.gmra.mxu0 %vm445_vm2, %v1599_v52 }
 0xce7   :  { %3213 = vmatprep.mubr.msk.f32.mxu0 %vm3771_vm1, %v3770_v40 }
 0xd4d   :  { %v1770_v54 = vpop.permute.xlu1 %1769 }
 0xd4e   :  { %3212 = vmatpush3.xpose.msk.msra.mxu0 %vm445_vm2, %v1770_v54 }
 0xd4f   :  { %3216 = vmatprep.subr.mxu0 %v3770_v40 }
 0xd51   :  { %v1846_v37 = vpop.permute.xlu0 %1845  ;;  %3214 = vmatmul.mubr.msk.f32.vlgmr.msra.gmra.mxu0 %vm445_vm2, %v1606_v42 }
 0xd52   :  { %3217 = vmatpush3.xpose.msk.msra.mxu0 %vm445_vm2, %v1846_v37  ;;  %3218 = vmatprep.mubr.msk.f32.mxu0 %vm3771_vm1, %v3770_v40 }
 0xd53   :  { %3226 = vmatprep.subr.mxu0 %v3770_v40 }
 0xd55   :  { %3219 = vmatmul.mubr.msk.f32.vlgmr.msra.gmra.mxu0 %vm445_vm2, %v1608_v43  ;;  %v3393_v43 = vld [vmem:[%s4400_s7 + $0x38] sm:$0xff]  }
 0xd56   :  { %3227 = vmatpush3.msra.mxu0 %v1601_v57  ;;  %3228 = vmatprep.mubr.msk.f32.mxu0 %vm3771_vm1, %v3770_v40 }
 0xd57   :  { %3236 = vmatprep.subr.mxu0 %v3770_v40 }
 0xda2   :  { %v1689_v58 = vpop.f32.mrf.mxu0 }
 0xda3   :  { %v1921_v59 = vmul.f32 0.17677669, %v1689_v58  ;;  %v3396_v58 = vld [vmem:[%s4400_s7 + $0x20] sm:$0xff]  }
 0xda4   :  { %v3205_v38 = vpop.f32.mrf.mxu0 }
 0xda5   :  { %v1925_v60 = vadd.f32 %v1921_v59, %v4042_v9 }
 0xda6   :  { %v1765_v61 = vpop.f32.mrf.mxu0 }
 0xda7   :  { %v1922_v62 = vmul.f32 0.17677669, %v1765_v61  ;;  %v1929_v63 = vsel %vm756_vm3, %v1925_v60, -inf }
 0xda8   :  { %1930 = vmax.xlane.f32.xlu1 %v1929_v63  ;;  %v3210_v0 = vpop.f32.mrf.mxu0 }
 0xda9   :  { %v1926_v1 = vadd.f32 %v1922_v62, %v4046_v15 }
 0xdab   :  { %v1932_v2 = vsel %vm756_vm3, %v1926_v1, -inf }
 0xdac   :  { %1933 = vmax.xlane.f32.xlu0 %v1932_v2 }
 0xe11   :  { %v1841_v55 = vpop.f32.mrf.mxu0 }
 0xe12   :  { %v1923_v51 = vmul.f32 0.17677669, %v1841_v55 }
 0xe13   :  { %v3215_v3 = vpop.f32.mrf.mxu0 }
 0xe14   :  { %v1927_v4 = vadd.f32 %v1923_v51, %v4042_v9  ;;  %v2983_v3 = vld [vmem:[#allocation10 + $0x1] ss:$0 sm:$0xff] }
 0xe15   :  { %v1917_v5 = vpop.f32.mrf.mxu0 }
 0xe16   :  { %v1924_v6 = vmul.f32 0.17677669, %v1917_v5  ;;  %v1935_v7 = vsel %vm756_vm3, %v1927_v4, -inf }
 0xe17   :  { %1936 = vmax.xlane.f32.xlu0 %v1935_v7  ;;  %v3220_v8 = vpop.f32.mrf.mxu0 }
 0xe18   :  { %v1928_v10 = vadd.f32 %v1924_v6, %v4046_v15 }
 0xe1a   :  { %v1938_v11 = vsel %vm756_vm3, %v1928_v10, -inf }
 0xe1b   :  { %1939 = vmax.xlane.f32.xlu0 %v1938_v11 }
 0xe31   :  { %v1931_v12 = vpop.xlane.xlu1 %1930 }
 0xe32   :  { %v1941_v13 = vsub.f32 %v1925_v60, %v1931_v12 }
 0xe34   :  { %v1945_v14 = vmul.f32 1.442695, %v1941_v13 }
 0xe35   :  { %v1934_v16 = vpop.xlane.xlu0 %1933 }
 0xe36   :  { %3445 = vpow2.f32 %v1945_v14  ;;  %v1942_v17 = vsub.f32 %v1926_v1, %v1934_v16 }
 0xe38   :  { %v1947_v18 = vmul.f32 1.442695, %v1942_v17 }
 0xe3a   :  { %3447 = vpow2.f32 %v1947_v18 }
 0xe43   :  { %v3446_v9 = vpop.eup %3445 }
 0xe44   :  { %v1953_v19 = vsel %vm756_vm3, %v3446_v9, 0.0 }
 0xe45   :  { %1954 = vadd.xlane.f32.xlu1 %v1953_v19 }
 0xe47   :  { %v3448_v20 = vpop.eup %3447 }
 0xe48   :  { %v1956_v21 = vsel %vm756_vm3, %v3448_v20, 0.0 }
 0xe49   :  { %1957 = vadd.xlane.f32.xlu0 %v1956_v21 }
 0xea0   :  { %v1937_v15 = vpop.xlane.xlu0 %1936 }
 0xea1   :  { %v1943_v22 = vsub.f32 %v1927_v4, %v1937_v15 }
 0xea3   :  { %v1949_v23 = vmul.f32 1.442695, %v1943_v22 }
 0xea4   :  { %v1940_v24 = vpop.xlane.xlu0 %1939 }
 0xea5   :  { %3449 = vpow2.f32 %v1949_v23  ;;  %v1944_v25 = vsub.f32 %v1928_v10, %v1940_v24  ;;  %v3397_v23 = vld [vmem:[#allocation14 + $0x38] sm:$0xff]   ;;  %v3399_v24 = vld [vmem:[#allocation14 + $0x28] sm:$0xff]  }
 0xea7   :  { %v1951_v26 = vmul.f32 1.442695, %v1944_v25  ;;  %v3400_v25 = vld [vmem:[#allocation14 + $0x20] sm:$0xff]  }
 0xea9   :  { %3451 = vpow2.f32 %v1951_v26 }
 0xeb2   :  { %v3450_v27 = vpop.eup %3449 }
 0xeb3   :  { %v1959_v28 = vsel %vm756_vm3, %v3450_v27, 0.0 }
 0xeb4   :  { %1960 = vadd.xlane.f32.xlu1 %v1959_v28 }
 0xeb6   :  { %v3452_v29 = vpop.eup %3451 }
 0xeb7   :  { %v1962_v30 = vsel %vm756_vm3, %v3452_v29, 0.0 }
 0xeb8   :  { %1963 = vadd.xlane.f32.xlu0 %v1962_v30 }
 0xec5   :  { %1611 = vrot.lane.b32.xlu1 %v4193_v49, %s3772_s5 }
 0xece   :  { %1613 = vrot.lane.b32.xlu0 %v1601_v57, %s3772_s5  ;;  %v1955_v31 = vpop.xlane.xlu1 %1954 }
 0xecf   :  { %3453 = vrcp.f32 %v1955_v31 }
 0xed2   :  { %v1958_v32 = vpop.xlane.xlu0 %1957 }
 0xed3   :  { %3455 = vrcp.f32 %v1958_v32 }
 0xedc   :  { %v3454_v33 = vpop.eup %3453 }
 0xedd   :  { %v1969_v36 = vmul.f32 %v3454_v33, %v3446_v9 }
 0xedf   :  { %3224 = vmatmul.mubr.msk.f32.vlgmr.msra.gmra.mxu1 %vm756_vm3, %v1969_v36  ;;  %v2989_v36 = vld [vmem:[#allocation11 + $0x1] ss:$0 sm:$0xff] }
 0xee0   :  { %v3456_v39 = vpop.eup %3455  ;;  %3233 = vmatprep.mubr.msk.f32.mxu1 %vm3771_vm1, %v3770_v40 }
 0xee1   :  { %v1970_v41 = vmul.f32 %v3456_v39, %v3448_v20 }
 0xee3   :  { %3229 = vmatmul.mubr.msk.f32.vlgmr.msra.gmra.mxu0 %vm756_vm3, %v1970_v41 }
 0xee4   :  { %3238 = vmatprep.mubr.msk.f32.mxu0 %vm3771_vm1, %v3770_v40 }
 0xf3d   :  { %v1961_v44 = vpop.xlane.xlu1 %1960 }
 0xf3e   :  { %3457 = vrcp.f32 %v1961_v44 }
 0xf41   :  { %v1964_v46 = vpop.xlane.xlu0 %1963  ;;  %v1612_v47 = vpop.permute.xlu1 %1611 }
 0xf42   :  { %3459 = vrcp.f32 %v1964_v46  ;;  %3232 = vmatpush3.msra.mxu1 %v1612_v47  ;;  %v2990_v46 = vld [vmem:[#allocation13 + $0x1] ss:$0 sm:$0xff] }
 0xf43   :  { %3241 = vmatprep.subr.bf16.mxu1 %v3770_v40 }
 0xf45   :  { %v1614_v48 = vpop.permute.xlu0 %1613 }
 0xf46   :  { %3237 = vmatpush3.msra.mxu0 %v1614_v48 }
 0xf47   :  { %3253 = vmatprep.subr.bf16.mxu0 %v3770_v40 }
 0xf4b   :  { %v3458_v49 = vpop.eup %3457 }
 0xf4c   :  { %v1971_v50 = vmul.f32 %v3458_v49, %v3450_v27 }
 0xf4e   :  { %3234 = vmatmul.mubr.msk.f32.vlgmr.msra.gmra.mxu1 %vm756_vm3, %v1971_v50 }
 0xf4f   :  { %v3460_v52 = vpop.eup %3459  ;;  %3249 = vmatprep.mubr.msk.bf16.mxu1 %vm3771_vm1, %v3770_v40  ;;  %3242 = vmatpush3.bf16.msra.mxu1 %v3393_v43  ;;  %v3403_v43 = vld [vmem:[%s4406_s13 + $0x68] sm:$0xff]  }
 0xf50   :  { %v1972_v42 = vmul.f32 %v3460_v52, %v3452_v29  ;;  %3243 = vmatprep.subr.bf16.mxu1 %v3770_v40  ;;  %v3401_v52 = vld [vmem:[%s4406_s13 + $0x78] sm:$0xff]  }
 0xf52   :  { %3239 = vmatmul.mubr.msk.f32.vlgmr.msra.gmra.mxu0 %vm756_vm3, %v1972_v42  ;;  %v3402_v42 = vld [vmem:[%s4406_s13 + $0x70] sm:$0xff]  }
 0xf53   :  { %3261 = vmatprep.mubr.msk.bf16.mxu0 %vm3771_vm1, %v3770_v40  ;;  %3244 = vmatpush3.bf16.msra.mxu1 %v3394_v45  ;;  %v3404_v45 = vld [vmem:[%s4406_s13 + $0x60] sm:$0xff]  }
 0xf54   :  { %3245 = vmatprep.subr.bf16.mxu1 %v3770_v40  ;;  %3254 = vmatpush3.bf16.msra.mxu0 %v3397_v23 }
 0xf55   :  { %3255 = vmatprep.subr.bf16.mxu0 %v3770_v40 }
 0xf57   :  { %3246 = vmatpush3.bf16.msra.mxu1 %v3395_v53  ;;  %v3405_v53 = vld [vmem:[%s4406_s13 + $0x58] sm:$0xff]  }
 0xf58   :  { %3247 = vmatprep.subr.bf16.mxu1 %v3770_v40 }
 0xf5b   :  { %3248 = vmatpush3.bf16.msra.mxu1 %v3396_v58 }
 0xf5c   :  { %3265 = vmatprep.subr.bf16.mxu1 %v3770_v40 }
 0xf9f   :  { %v2042_v54 = vpop.f32.mrf.mxu1 }
 0xfa1   :  { %v3225_v56 = vpop.f32.mrf.mxu1 }
 0xfa2   :  { %v3407_v56 = vld [vmem:[%s4406_s13 + $0x48] sm:$0xff]  }
 0xfa3   :  { %v2115_v37 = vpop.f32.mrf.mxu0 }
 0xfa5   :  { %v3230_v57 = vpop.f32.mrf.mxu0 }
 0xfa6   :  { %v2991_v57 = vld [vmem:[#allocation16 + $0x1] ss:$0 sm:$0xff] }
0x100e   :  { %v2188_v59 = vpop.f32.mrf.mxu1 }
0x1010   :  { %v3235_v38 = vpop.f32.mrf.mxu1 }
0x1012   :  { %v2261_v60 = vpop.f32.mrf.mxu0 }
0x1013   :  { %v3347_v61 = vpack.i.bf16 %v2261_v60, %v2188_v59 }
0x1014   :  { %v3240_v62 = vpop.f32.mrf.mxu0 }
0x1015   :  { %3348 = vrot.lane.b32.xlu1 %v3347_v61, %s4432_s14 }
0x1087   :  { %v3349_v63 = vpop.permute.xlu1 %3348 }
0x1088   :  { %v3351_v0 = vunpack.i.h.bf16 %v3349_v63  ;;  %v3350_v1 = vunpack.i.l.bf16 %v3349_v63 }
0x108a   :  { %v2274_v2 = vsel %vm445_vm2, %v2115_v37, %v3351_v0  ;;  %v2273_v55 = vsel %vm445_vm2, %v2042_v54, %v3350_v1  ;;  %v3406_v54 = vld [vmem:[%s4406_s13 + $0x50] sm:$0xff]   ;;  %v3408_v37 = vld [vmem:[%s4406_s13 + $0x40] sm:$0xff]   ;;  %s4433_s13 = sld [smem:[#allocation33_spill]] }
0x108b   :  { %v2286_v51 = vpack.c.bf16 %v2274_v2, %v2273_v55 }
0x108d   :  { %3250 = vmatmul.mubr.msk.bf16.vlgmr.msra.gmra.mxu1 %vm278_vm0, %v2286_v51 }
0x108e   :  { %3281 = vmatprep.mubr.msk.bf16.mxu1 %vm3771_vm1, %v3770_v40  ;;  %3266 = vmatpush3.bf16.msra.mxu1 %v3401_v52 }
0x108f   :  { %3267 = vmatprep.subr.bf16.mxu1 %v3770_v40 }
0x1092   :  { %3268 = vmatpush3.bf16.msra.mxu1 %v3402_v42 }
0x1093   :  { %3269 = vmatprep.subr.bf16.mxu1 %v3770_v40 }
0x1096   :  { %3270 = vmatpush3.bf16.msra.mxu1 %v3403_v43 }
0x1097   :  { %3271 = vmatprep.subr.bf16.mxu1 %v3770_v40 }
0x109a   :  { %3272 = vmatpush3.bf16.msra.mxu1 %v3404_v45  ;;  %v3022_v45 = vld [vmem:[#allocation19 + $0x1] ss:$0 sm:$0xff] }
0x109b   :  { %3273 = vmatprep.subr.bf16.mxu1 %v3770_v40 }
0x109e   :  { %3274 = vmatpush3.bf16.msra.mxu1 %v3405_v53 }
0x109f   :  { %3275 = vmatprep.subr.bf16.mxu1 %v3770_v40 }
0x10a2   :  { %3276 = vmatpush3.bf16.msra.mxu1 %v3406_v54 }
0x10a3   :  { %3277 = vmatprep.subr.bf16.mxu1 %v3770_v40 }
0x10a6   :  { %3278 = vmatpush3.bf16.msra.mxu1 %v3407_v56 }
0x10a7   :  { %3279 = vmatprep.subr.bf16.mxu1 %v3770_v40 }
0x10aa   :  { %3280 = vmatpush3.bf16.msra.mxu1 %v3408_v37  ;;  %v3023_v37 = vld [vmem:[#allocation20 + $0x1] ss:$0 sm:$0xff] }
0x114d   :  { %v2354_v4 = vpop.f32.mrf.mxu1 }
0x114e   :  { %v2355_v5 = vadd.f32 %v2983_v3, %v2354_v4 }
0x114f   :  { %v3251_v6 = vpop.f32.mrf.mxu1 }
0x1150   :  { %v2361_v7 = vadd.f32 %v2355_v5, %v4181_v34 }
0x1151   :  { %v2357_v8 = vpop.f32.mrf.mxu1 }
0x1152   :  { %v2358_v10 = vadd.f32 %v2983_v3, %v2357_v8  ;;  %v2367_v11 = vsel %vm278_vm0, %v2361_v7, 0.0 }
0x1153   :  { %2368 = vadd.xlane.f32.xlu1 %v2367_v11  ;;  %v3252_v12 = vpop.f32.mrf.mxu1 }
0x1154   :  { %v2362_v13 = vadd.f32 %v2358_v10, %v4183_v35  ;;  %v3398_v35 = vld [vmem:[#allocation14 + $0x30] sm:$0xff]  }
0x1155   :  { %3256 = vmatpush3.bf16.msra.mxu0 %v3398_v35 }
0x1156   :  { %v2370_v14 = vsel %vm278_vm0, %v2362_v13, 0.0  ;;  %3257 = vmatprep.subr.bf16.mxu0 %v3770_v40 }
0x1157   :  { %2371 = vadd.xlane.f32.xlu0 %v2370_v14 }
0x1159   :  { %3258 = vmatpush3.bf16.msra.mxu0 %v3399_v24 }
0x115a   :  { %3259 = vmatprep.subr.bf16.mxu0 %v3770_v40 }
0x115d   :  { %3260 = vmatpush3.bf16.msra.mxu0 %v3400_v25 }
0x115e   :  { %3285 = vmatprep.subr.bf16.mxu0 %v3770_v40 }
0x11dc   :  { %v2369_v16 = vpop.xlane.xlu1 %2368 }
0x11dd   :  { %v2373_v17 = vmul.f32 0.015625, %v2369_v16 }
0x11df   :  { %v2375_v18 = vsub.f32 %v2361_v7, %v2373_v17 }
0x11e0   :  { %v2372_v9 = vpop.xlane.xlu0 %2371 }
0x11e1   :  { %v2374_v19 = vmul.f32 0.015625, %v2372_v9  ;;  %v2377_v20 = vmul.f32 %v2375_v18, %v2375_v18 }
0x11e3   :  { %v2376_v21 = vsub.f32 %v2362_v13, %v2374_v19  ;;  %v2379_v34 = vsel %vm278_vm0, %v2377_v20, 0.0 }
0x11e4   :  { %2380 = vadd.xlane.f32.xlu0 %v2379_v34 }
0x11e5   :  { %v2378_v15 = vmul.f32 %v2376_v21, %v2376_v21 }
0x11e7   :  { %v2382_v22 = vsel %vm278_vm0, %v2378_v15, 0.0 }
0x11e8   :  { %2383 = vadd.xlane.f32.xlu1 %v2382_v22 }
0x126d   :  { %v2381_v26 = vpop.xlane.xlu0 %2380 }
0x126e   :  { %v2385_v27 = vmul.f32 0.015625, %v2381_v26 }
0x1270   :  { %v2387_v28 = vadd.f32 1e-12, %v2385_v27 }
0x1271   :  { %v2384_v29 = vpop.xlane.xlu1 %2383 }
0x1272   :  { %3461 = vrsqrt.f32 %v2387_v28  ;;  %v2386_v30 = vmul.f32 0.015625, %v2384_v29 }
0x1274   :  { %v2388_v31 = vadd.f32 1e-12, %v2386_v30 }
0x1276   :  { %3463 = vrsqrt.f32 %v2388_v31 }
0x127f   :  { %v3462_v32 = vpop.eup %3461 }
0x1280   :  { %v2391_v33 = vmul.f32 %v3462_v32, %v2375_v18  ;;  %v3013_v18 = vld [vmem:[#allocation17 + $0x1] ss:$0 sm:$0xff] }
0x1282   :  { %v2399_v44 = vmul.f32 %v2989_v36, %v2391_v33 }
0x1283   :  { %v3464_v39 = vpop.eup %3463 }
0x1284   :  { %v2392_v41 = vmul.f32 %v3464_v39, %v2376_v21  ;;  %v2407_v48 = vadd.f32 %v2990_v46, %v2399_v44  ;;  %v3409_v39 = vld [vmem:[%s4410_s17 + $0x18] sm:$0xff]   ;;  %v3411_v44 = vld [vmem:[%s4410_s17 + $0x8] sm:$0xff]  }
0x1286   :  { %v2400_v47 = vmul.f32 %v2989_v36, %v2392_v41  ;;  %v3410_v41 = vld [vmem:[%s4410_s17 + $0x10] sm:$0xff]  }
0x1288   :  { %v4285_v49 = vadd.f32 %v2990_v46, %v2400_v47  ;;  %v3412_v46 = vld [vmem:[%s4410_s17] sm:$0xff]  }
0x128a   :  { %v2420_v50 = vpack.c.bf16 %v4285_v49, %v2407_v48 }
0x128c   :  { %3262 = vmatmul.mubr.msk.bf16.vlgmr.msra.gmra.mxu0 %vm278_vm0, %v2420_v50 }
0x128d   :  { %3293 = vmatprep.mubr.msk.bf16.mxu0 %vm3771_vm1, %v3770_v40  ;;  %3286 = vmatpush3.bf16.msra.mxu0 %v3409_v39 }
0x128e   :  { %3287 = vmatprep.subr.bf16.mxu0 %v3770_v40 }
0x1291   :  { %3288 = vmatpush3.bf16.msra.mxu0 %v3410_v41 }
0x1292   :  { %3289 = vmatprep.subr.bf16.mxu0 %v3770_v40 }
0x1295   :  { %3290 = vmatpush3.bf16.msra.mxu0 %v3411_v44 }
0x1296   :  { %3291 = vmatprep.subr.bf16.mxu0 %v3770_v40 }
0x1299   :  { %3292 = vmatpush3.bf16.msra.mxu0 %v3412_v46 }
0x129a   :  { %3297 = vmatprep.subr.mxu0 %v3770_v40 }
0x134c   :  { %v2488_v58 = vpop.f32.mrf.mxu0 }
0x134d   :  { %v2489_v59 = vadd.f32 %v2991_v57, %v2488_v58 }
0x134e   :  { %v3263_v38 = vpop.f32.mrf.mxu0 }
0x134f   :  { %v2495_v60 = vmul.f32 %v2489_v59, %v2489_v59 }
0x1350   :  { %v2491_v61 = vpop.f32.mrf.mxu0 }
0x1351   :  { %v2497_v62 = vmul.f32 %v2495_v60, %v2489_v59  ;;  %v2492_v63 = vadd.f32 %v2991_v57, %v2491_v61 }
0x1352   :  { %v3264_v0 = vpop.f32.mrf.mxu0 }
0x1353   :  { %v2499_v1 = vmul.f32 0.044715, %v2497_v62  ;;  %v2496_v2 = vmul.f32 %v2492_v63, %v2492_v63 }
0x1355   :  { %v2501_v55 = vadd.f32 %v2499_v1, %v2489_v59  ;;  %v2498_v51 = vmul.f32 %v2496_v2, %v2492_v63 }
0x1357   :  { %v2503_v3 = vmul.f32 0.7978846, %v2501_v55  ;;  %v2500_v4 = vmul.f32 0.044715, %v2498_v51  ;;  %v2776_v55 = vld [vmem:[%s4412_s19 + $0x38] sm:$0xff]  ;;  %v2775_v51 = vld [vmem:[%s4412_s19 + $0x30] sm:$0xff] }
0x1359   :  { %3465 = vtanh.f32 %v2503_v3  ;;  %v2502_v5 = vadd.f32 %v2500_v4, %v2492_v63  ;;  %v2774_v3 = vld [vmem:[%s4412_s19 + $0x28] sm:$0xff]  ;;  %v2773_v4 = vld [vmem:[%s4412_s19 + $0x20] sm:$0xff] }
0x135b   :  { %v2504_v6 = vmul.f32 0.7978846, %v2502_v5  ;;  %v2772_v5 = vld [vmem:[%s4412_s19 + $0x18] sm:$0xff] }
0x135d   :  { %3467 = vtanh.f32 %v2504_v6  ;;  %v2771_v6 = vld [vmem:[%s4412_s19 + $0x10] sm:$0xff] }
0x1366   :  { %v3466_v7 = vpop.eup %3465 }
0x1367   :  { %v2507_v8 = vadd.f32 1.0, %v3466_v7  ;;  %v2770_v7 = vld [vmem:[%s4412_s19 + $0x8] sm:$0xff] }
0x1369   :  { %v2509_v11 = vmul.f32 0.5, %v2507_v8  ;;  %v2769_v8 = vld [vmem:[%s4412_s19] sm:$0xff] }
0x136a   :  { %v3468_v10 = vpop.eup %3467 }
0x136b   :  { %v2508_v12 = vadd.f32 1.0, %v3468_v10  ;;  %v2511_v14 = vmul.f32 %v2509_v11, %v2489_v59  ;;  %v2777_v10 = vld [vmem:[%s4433_s13] sm:$0x3] }
0x136c   :  { %v3024_v11 = vld [vmem:[%s4411_s18] ss:$0 sm:$0xff]  ;;  %s3774_s18 = smov [#allocation22]  }
0x136d   :  { %v2510_v13 = vmul.f32 0.5, %v2508_v12  ;;  %s2880_s27 = sshll.u32 %s3774_s18, 4  ;;  %s2881_s27 = int_to_ptr.vmem [resolvable:$true] %s2880_s27 }
0x136e   :  { %s3713_s3 = scalar_lea.vmem %s2881_s27, 32  ;;  %p3718_p5 = scmp.lt.s32.totalorder %s2881_s27, %s2881_s27 }
0x136f   :  { %v2512_v16 = vmul.f32 %v2510_v13, %v2492_v63  ;;  %p3714_p4 = scmp.ne.s32.totalorder %s2881_s27, %s3713_s3  ;;  %p3719_p6 = scmp.lt.s32.totalorder %s3713_s3, %s3713_s3 }
0x1371   :  { %v2532_v17 = vpack.c.bf16 %v2512_v16, %v2511_v14  ;;  %p3720_p7 = por %p3719_p6, %p3718_p5 }
0x1373   :  { %3282 = vmatmul.mubr.bf16.vlgmr.msra.gmra.mxu1 %v2532_v17  ;;  %p3721_p8 = pnand %p3720_p7, %p3714_p4 }
0x1433   :  { %v2621_v9 = vpop.f32.mrf.mxu1 }
0x1434   :  { %v2622_v19 = vadd.f32 %v3013_v18, %v2621_v9 }
0x1435   :  { %v3283_v20 = vpop.f32.mrf.mxu1 }
0x1436   :  { %v2628_v21 = vadd.f32 %v2622_v19, %v2407_v48 }
0x1437   :  { %v2624_v34 = vpop.f32.mrf.mxu1 }
0x1438   :  { %v2625_v15 = vadd.f32 %v3013_v18, %v2624_v34  ;;  %v2634_v22 = vsel %vm278_vm0, %v2628_v21, 0.0  ;;  %v3030_v18 = vld [vmem:[%s4413_s20] ss:$0 sm:$0xff] }
0x1439   :  { %2635 = vadd.xlane.f32.xlu1 %v2634_v22  ;;  %v3284_v23 = vpop.f32.mrf.mxu1 }
0x143a   :  { %v2629_v35 = vadd.f32 %v2625_v15, %v4285_v49 }
0x143c   :  { %v2637_v24 = vsel %vm278_vm0, %v2629_v35, 0.0 }
0x143d   :  { %2638 = vadd.xlane.f32.xlu0 %v2637_v24 }
0x14c2   :  { %v2636_v25 = vpop.xlane.xlu1 %2635 }
0x14c3   :  { %v2640_v26 = vmul.f32 0.015625, %v2636_v25 }
0x14c5   :  { %v2642_v27 = vsub.f32 %v2628_v21, %v2640_v26  ;;  %v3032_v21 = vld [vmem:[%s4414_s21] ss:$0 sm:$0xff] }
0x14c6   :  { %v2639_v28 = vpop.xlane.xlu0 %2638 }
0x14c7   :  { %v2641_v29 = vmul.f32 0.015625, %v2639_v28  ;;  %v2644_v30 = vmul.f32 %v2642_v27, %v2642_v27 }
0x14c9   :  { %v2643_v31 = vsub.f32 %v2629_v35, %v2641_v29  ;;  %v2646_v32 = vsel %vm278_vm0, %v2644_v30, 0.0 }
0x14ca   :  { %2647 = vadd.xlane.f32.xlu1 %v2646_v32 }
0x14cb   :  { %v2645_v33 = vmul.f32 %v2643_v31, %v2643_v31 }
0x14cd   :  { %v2649_v36 = vsel %vm278_vm0, %v2645_v33, 0.0 }
0x14ce   :  { %2650 = vadd.xlane.f32.xlu0 %v2649_v36 }
0x14e4   :  { %2781 = vperm.xlu0 %3352, %v2777_v10  }
0x1553   :  { %v2648_v47 = vpop.xlane.xlu1 %2647 }
0x1554   :  { %v2652_v48 = vmul.f32 0.015625, %v2648_v47 }
0x1556   :  { %v2654_v49 = vadd.f32 1e-12, %v2652_v48 }
0x1557   :  { %v2651_v50 = vpop.xlane.xlu0 %2650 }
0x1558   :  { %3469 = vrsqrt.f32 %v2654_v49  ;;  %v2653_v52 = vmul.f32 0.015625, %v2651_v50 }
0x155a   :  { %v2655_v42 = vadd.f32 1e-12, %v2653_v52 }
0x155c   :  { %3471 = vrsqrt.f32 %v2655_v42 }
0x155f   :  { %v2782_v9 = vpop.permute.xlu0 %2781 }
0x1560   :  { %v2790_v19 = vmul.f32 %v3030_v18, %v2782_v9 }
0x1565   :  { %v3470_v43 = vpop.eup %3469 }
0x1566   :  { %v2658_v53 = vmul.f32 %v3470_v43, %v2642_v27 }
0x1568   :  { %v2666_v54 = vmul.f32 %v3022_v45, %v2658_v53 }
0x1569   :  { %v3472_v56 = vpop.eup %3471 }
0x156a   :  { %v2659_v57 = vmul.f32 %v3472_v56, %v2643_v31  ;;  %v2674_v59 = vadd.f32 %v3023_v37, %v2666_v54 }
0x156c   :  { %v2667_v58 = vmul.f32 %v3022_v45, %v2659_v57  ;;  %v2685_v60 = vpack.c.bf16 %v2674_v59, %v2674_v59 }
0x156e   :  { %v2675_v38 = vadd.f32 %v3023_v37, %v2667_v58  ;;  %v2695_v63 = vunpack.c.l.b16 %v2685_v60 }
0x1570   :  { %v2686_v61 = vpack.c.bf16 %v2675_v38, %v2675_v38 }
0x1572   :  { %v2696_v62 = vunpack.c.l.b16 %v2686_v61 }
0x1574   :  { %v2697_v0 = vrot.slane %v2696_v62, 7 }
0x1576   :  { %v2699_v1 = vsel %vm2698_vm4, %v2697_v0, %v2695_v63 }
0x1577   :  { %v2700_v2 = vpack.c.b16 %v2699_v1, %v2699_v1 }
0x1579   :  { %3294 = vmatmul.mubr.msk.bf16.vlgmr.msra.gmra.mxu0 %vm278_vm0, %v2700_v2 }
0x157a   :  { %3298 = vmatpush3.msra.mxu0 %v2776_v55  ;;  %3313 = vmatprep.mubr.msk.f32.mxu0 %vm3771_vm1, %v3770_v40 }
0x157b   :  { %3299 = vmatprep.subr.mxu0 %v3770_v40 }
0x157c   :  { %3300 = vmatpush3.msra.mxu0 %v2775_v51 }
0x157d   :  { %3301 = vmatprep.subr.mxu0 %v3770_v40 }
0x157e   :  { %3302 = vmatpush3.msra.mxu0 %v2774_v3 }
0x157f   :  { %3303 = vmatprep.subr.mxu0 %v3770_v40 }
0x1580   :  { %3304 = vmatpush3.msra.mxu0 %v2773_v4 }
0x1581   :  { %3305 = vmatprep.subr.mxu0 %v3770_v40 }
0x1582   :  { %3306 = vmatpush3.msra.mxu0 %v2772_v5 }
0x1583   :  { %3307 = vmatprep.subr.mxu0 %v3770_v40 }
0x1584   :  { %3308 = vmatpush3.msra.mxu0 %v2771_v6 }
0x1585   :  { %3309 = vmatprep.subr.mxu0 %v3770_v40 }
0x1586   :  { %3310 = vmatpush3.msra.mxu0 %v2770_v7 }
0x1587   :  { %3311 = vmatprep.subr.mxu0 %v3770_v40 }
0x1588   :  { %3312 = vmatpush3.msra.mxu0 %v2769_v8 }
0x1639   :  { %v2762_v12 = vpop.f32.mrf.mxu0 }
0x163a   :  { %v2763_v13 = vadd.f32 %v3024_v11, %v2762_v12 }
0x163b   :  { %v3295_v14 = vpop.f32.mrf.mxu0 }
0x163c   :  { %v2768_v16 = vmax.f32 %v2763_v13, 0.0 }
0x163d   :  { %v2765_v17 = vpop.f32.mrf.mxu0 }
0x163e   :  { %3314 = vmatmul.mubr.msk.f32.vlgmr.msra.gmra.mxu0 %vm278_vm0, %v2768_v16 }
0x163f   :  { %v3296_v40 = vpop.f32.mrf.mxu0 }
0x16fe   :  { %v2860_v20 = vpop.f32.mrf.mxu0 }
0x16ff   :  { %v2861_v34 = vadd.f32 %v2860_v20, %v2790_v19 }
0x1700   :  { %v3315_v15 = vpop.f32.mrf.mxu0 }
0x1701   :  { %v2871_v22 = vadd.f32 %v3032_v21, %v2861_v34 }
0x1703   :  { %2873 = vst.msk [vmem:[#allocation22] sm:$0x3] %vm2872_vm5, %v2871_v22 }
0x1704   :  { %3724 = shalt.err (!%p3721_p8)
}
0x1705   :  { %2883 = dma.vmem_to_hbm [thread:$0]  %s2881_s27, 32, %s4415_s22, [#allocation4]  }
0x1706   :  { %3747 = dma.done.wait [#allocation4], 32  }
0x1707   :  { %3748 = vsyncadd [#allocation4], 4294967264 }
0x1708   :  { %2887 = vsyncpa [#allocation3], 1 }
0x1709   :  { %2888 = vsyncpa [#allocation6], 1 }
0x170a   :  { %2889 = vsyncpa [#allocation9], 1 }
0x170b   :  { %2890 = vsyncpa [#allocation12], 1 }
0x170c   :  { %2891 = vsyncpa [#allocation15], 1 }
0x170d   :  { %2892 = vsyncpa [#allocation18], 1 }
0x170e   :  { %2893 = vsyncpa [#allocation21], 1 }
0x170f   :  { %2894 = vsyncpa [#allocation4], 1 }

</bundles_post_ra>
